<compile_context>
chip_gen: v7x
topology: tpu7x:2x2x1
jax: 0.10.0
libtpu: 0.0.40
codegen_flags: <defaults>
</compile_context>

<pallas_src>
import functools

import jax
import jax.numpy as jnp
from jax.experimental import pallas as pl
from jax.experimental.pallas import tpu as pltpu


LN_EPS = 1e-12


def _gelu_new(x):
    # ALBERT's gelu_new (tanh approximation), computed in f32.
    return 0.5 * x * (1.0 + jnp.tanh(0.7978845608028654 * (x + 0.044715 * x * x * x)))


def _nbytes(*arrs):
    return sum(int(a.size) * jnp.dtype(a.dtype).itemsize for a in arrs)


def _vmem_limit(resident_bytes, per_step_bytes):
    """Scoped-VMEM request: resident weights + double-buffered per-step blocks + slack."""
    need = int(resident_bytes) + 2 * int(per_step_bytes) + (4 << 20)
    # Stay above the 16/32 MiB defaults but below v7x's 64 MiB physical VMEM.
    return int(min(max(need, 32 << 20), 60 << 20))


def _max_row_tile():
    try:
        kind = jax.devices()[0].device_kind.lower()
    except Exception:
        return 256
    if "v5 lite" in kind or "v5e" in kind or "v5lite" in kind:
        return 128     # v5e: 4x128^2 MXU, 16 MiB default scoped VMEM
    return 256         # v6e/v7x: 2x256^2 MXU


def _row_tile(m):
    t = _max_row_tile()
    return m if m <= t else t


# --------------------------------------------------------------------------------------
# Pallas kernels
# --------------------------------------------------------------------------------------
def albert_encoder_kernel(h0_ref, mask_ref,
                          qkv_w_ref, qkv_b_ref,
                          ao_w_ref, ao_b_ref, attn_g_ref, attn_bt_ref,
                          ffn_w_ref, ffn_b_ref, ffn_ow_ref, ffn_ob_ref,
                          ffn_g_ref, ffn_bt_ref,
                          out_ref, *, hidden, heads, head_dim, scale, eps):
    """One shared ALBERT layer applied to one batch element.

    grid = (B, num_layers). The output block (1, S, H) is revisited across the layer
    axis, so it carries the hidden state layer-to-layer entirely in VMEM; all weight
    blocks use constant index_maps and are fetched from HBM exactly once per call.
    """
    layer = pl.program_id(1)

    @pl.when(layer == 0)
    def _():
        out_ref[...] = h0_ref[...]

    H = hidden
    x = out_ref[0]                                   # (S, H) bf16 hidden state
    x_f32 = x.astype(jnp.float32)
    m = mask_ref[0]                                  # (1, S) f32 additive mask over keys

    # ---- self-attention: packed QKV projection, per-head attention, all in VMEM ----
    qkv = jnp.dot(x, qkv_w_ref[...], preferred_element_type=jnp.float32)
    qkv = (qkv + qkv_b_ref[...]).astype(x.dtype)     # (S, 3H) bf16
    # TODO(synk): at production sizes (nh=12, S>=512) replace this unrolled per-head loop
    # with a batched einsum + flash-style KV tiling (online softmax) so the (S,S) score
    # block stays bounded in VMEM.
    ctx_heads = []
    for head in range(heads):
        lo = head * head_dim
        qh = qkv[:, lo:lo + head_dim]                # (S, dh) static lane slices
        kh = qkv[:, H + lo:H + lo + head_dim]
        vh = qkv[:, 2 * H + lo:2 * H + lo + head_dim]
        s = jax.lax.dot_general(qh, kh, (((1,), (1,)), ((), ())),
                                preferred_element_type=jnp.float32) * scale  # (S, S)
        s = s + m
        smax = jnp.max(s, axis=-1, keepdims=True)
        p = jnp.exp(s - smax)
        denom = jnp.sum(p, axis=-1, keepdims=True)
        # approx reciprocal runs on the EUP slot; probs sum to 1 within ~1e-3 here.
        p = p * pl.reciprocal(denom, approx=True)
        ctx_heads.append(jnp.dot(p.astype(vh.dtype), vh,
                                 preferred_element_type=jnp.float32))
    ctx = jnp.concatenate(ctx_heads, axis=-1).astype(x.dtype)   # (S, H) lane-dense

    # ---- attention-output dense + residual + layernorm ----
    y = jnp.dot(ctx, ao_w_ref[...], preferred_element_type=jnp.float32)
    y = y + ao_b_ref[...] + x_f32
    mu = jnp.mean(y, axis=-1, keepdims=True)
    var = jnp.mean((y - mu) * (y - mu), axis=-1, keepdims=True)
    h1 = (y - mu) * jax.lax.rsqrt(var + eps) * attn_g_ref[...] + attn_bt_ref[...]
    h1_bf = h1.astype(x.dtype)

    # ---- FFN (dense + gelu_new + dense) + residual + layernorm ----
    # TODO(synk): for ALBERT-large/xlarge on v7x (64 MiB VMEM), chunk the intermediate
    # dimension I with an in-kernel fori_loop accumulation so the f32 (S, I) gelu
    # intermediate never fully materializes in VMEM.
    ff = jnp.dot(h1_bf, ffn_w_ref[...], preferred_element_type=jnp.float32)
    ff = _gelu_new(ff + ffn_b_ref[...])
    y2 = jnp.dot(ff.astype(x.dtype), ffn_ow_ref[...], preferred_element_type=jnp.float32)
    y2 = y2 + ffn_ob_ref[...] + h1
    mu2 = jnp.mean(y2, axis=-1, keepdims=True)
    var2 = jnp.mean((y2 - mu2) * (y2 - mu2), axis=-1, keepdims=True)
    h2 = (y2 - mu2) * jax.lax.rsqrt(var2 + eps) * ffn_g_ref[...] + ffn_bt_ref[...]

    out_ref[0] = h2.astype(out_ref.dtype)


def emb_ln_proj_kernel(e_ref, g_ref, b_ref, w_ref, wb_ref, o_ref, *, eps):
    """o = LayerNorm(emb) @ map_w + map_b (embedding LN + factorized projection)."""
    e = e_ref[...].astype(jnp.float32)
    mu = jnp.mean(e, axis=-1, keepdims=True)
    var = jnp.mean((e - mu) * (e - mu), axis=-1, keepdims=True)
    y = (e - mu) * jax.lax.rsqrt(var + eps) * g_ref[...] + b_ref[...]
    h = jnp.dot(y.astype(w_ref.dtype), w_ref[...], preferred_element_type=jnp.float32)
    h = h + wb_ref[...]
    o_ref[...] = h.astype(o_ref.dtype)


def head_kernel(x_ref, pw_ref, pb_ref, cw_ref, cb_ref, lab_ref,
                logits_ref, probs_ref, loss_ref):
    """pooler(tanh dense) + classifier + softmax + mean cross-entropy, fused.

    NOTE: the mean loss reduction assumes the full batch lives in this single grid step
    (grid=(1,)); do not tile B across the grid without changing the reduction.
    """
    pooled = jnp.tanh(
        jnp.dot(x_ref[...], pw_ref[...], preferred_element_type=jnp.float32) + pb_ref[...])
    logits = jnp.dot(pooled.astype(cw_ref.dtype), cw_ref[...],
                     preferred_element_type=jnp.float32) + cb_ref[...]
    m = jnp.max(logits, axis=-1, keepdims=True)
    e = jnp.exp(logits - m)
    denom = jnp.sum(e, axis=-1, keepdims=True)
    logits_ref[...] = logits
    probs_ref[...] = e / denom                               # exact division on purpose
    labels = lab_ref[...]                                    # (B, 1) int32
    B, C = logits.shape
    cls_ids = jax.lax.broadcasted_iota(jnp.int32, (B, C), 1)
    onehot = (cls_ids == labels).astype(jnp.float32)
    logp = (logits - m) - jnp.log(denom)
    nll = -jnp.sum(onehot * logp, axis=-1, keepdims=True)    # (B, 1)
    loss_ref[...] = jnp.mean(nll, keepdims=True)             # (1, 1)


# --------------------------------------------------------------------------------------
# Pallas wrappers
# --------------------------------------------------------------------------------------
def pallas_albert_encoder(h0, ext_mask, lp, num_layers, cfg):
    B, S, H = h0.shape
    nh, dh, I = cfg["heads"], cfg["head_dim"], cfg["inter"]

    act_spec = pl.BlockSpec((1, S, H), lambda b, l: (b, 0, 0))
    mask_spec = pl.BlockSpec((1, 1, S), lambda b, l: (b, 0, 0))
    w = lambda r, c: pl.BlockSpec((r, c), lambda b, l: (0, 0))   # VMEM-resident weights

    weights = (lp["qkv_w"], lp["qkv_b"], lp["ao_w"], lp["ao_b"],
               lp["attn_ln_g"], lp["attn_ln_b"],
               lp["ffn_w"], lp["ffn_b"], lp["ffn_out_w"], lp["ffn_out_b"],
               lp["ffn_ln_g"], lp["ffn_ln_b"])
    # per-step f32 intermediates: qkv, scores/probs, gelu intermediate, a few (S,H) temps
    per_step = (S * 3 * H + nh * S * S + S * I + 6 * S * H) * 4 + 2 * S * H * 2
    params = pltpu.CompilerParams(
        dimension_semantics=("parallel", "arbitrary"),
        vmem_limit_bytes=_vmem_limit(_nbytes(*weights), per_step))

    kernel = functools.partial(albert_encoder_kernel, hidden=H, heads=nh, head_dim=dh,
                               scale=1.0 / (dh ** 0.5), eps=LN_EPS)

    return pl.pallas_call(
        kernel,
        out_shape=jax.ShapeDtypeStruct((B, S, H), h0.dtype),
        grid=(B, num_layers),
        in_specs=[
            act_spec, mask_spec,
            w(H, 3 * H), w(1, 3 * H),
            w(H, H), w(1, H), w(1, H), w(1, H),
            w(H, I), w(1, I), w(I, H), w(1, H),
            w(1, H), w(1, H),
        ],
        out_specs=act_spec,
        compiler_params=params,
    )(h0, ext_mask, *weights)


def pallas_emb_ln_proj(emb, g, b, w, wb, eps=LN_EPS):
    M, E = emb.shape
    H = w.shape[1]
    tm = _row_tile(M)
    Mp = ((M + tm - 1) // tm) * tm
    x = jnp.pad(emb, ((0, Mp - M), (0, 0))) if Mp != M else emb   # padded rows sliced away

    per_step = tm * (E + H) * 2 + tm * max(E, H) * 4 * 2
    params = pltpu.CompilerParams(
        dimension_semantics=("parallel",),
        vmem_limit_bytes=_vmem_limit(_nbytes(g, b, w, wb), per_step))

    out = pl.pallas_call(
        functools.partial(emb_ln_proj_kernel, eps=eps),
        out_shape=jax.ShapeDtypeStruct((Mp, H), w.dtype),
        grid=(Mp // tm,),
        in_specs=[
            pl.BlockSpec((tm, E), lambda i: (i, 0)),
            pl.BlockSpec((1, E), lambda i: (0, 0)),
            pl.BlockSpec((1, E), lambda i: (0, 0)),
            pl.BlockSpec((E, H), lambda i: (0, 0)),
            pl.BlockSpec((1, H), lambda i: (0, 0)),
        ],
        out_specs=pl.BlockSpec((tm, H), lambda i: (i, 0)),
        compiler_params=params,
    )(x, g, b, w, wb)
    return out[:M] if Mp != M else out


def pallas_cls_head(x, pw, pb, cw, cb, labels):
    B, H = x.shape
    C = cw.shape[1]
    params = pltpu.CompilerParams(
        dimension_semantics=("arbitrary",),
        vmem_limit_bytes=_vmem_limit(_nbytes(pw, pb, cw, cb), (B * H + B * C) * 8))
    return pl.pallas_call(
        head_kernel,
        out_shape=(
            jax.ShapeDtypeStruct((B, C), jnp.float32),
            jax.ShapeDtypeStruct((B, C), jnp.float32),
            jax.ShapeDtypeStruct((1, 1), jnp.float32),
        ),
        grid=(1,),
        in_specs=[
            pl.BlockSpec((B, H), lambda i: (0, 0)),
            pl.BlockSpec((H, H), lambda i: (0, 0)),
            pl.BlockSpec((1, H), lambda i: (0, 0)),
            pl.BlockSpec((H, C), lambda i: (0, 0)),
            pl.BlockSpec((1, C), lambda i: (0, 0)),
            pl.BlockSpec((B, 1), lambda i: (0, 0)),
        ],
        out_specs=[
            pl.BlockSpec((B, C), lambda i: (0, 0)),
            pl.BlockSpec((B, C), lambda i: (0, 0)),
            pl.BlockSpec((1, 1), lambda i: (0, 0)),
        ],
        compiler_params=params,
    )(x, pw, pb, cw, cb, labels)


# --------------------------------------------------------------------------------------
# ALBERT model (synthetic, deterministic weights)
# --------------------------------------------------------------------------------------
CFG = dict(
    vocab_size=100,
    max_pos=16,
    type_vocab=2,
    emb_size=16,
    hidden=32,
    heads=4,
    head_dim=8,
    inter=64,
    num_layers=2,
    num_labels=2,
)


def init_params(key, cfg):
    ks = iter(jax.random.split(key, 32))
    wdt = jnp.bfloat16   # matmul operands / embedding tables in bf16 (MXU native)
    n = lambda *shape: (jax.random.normal(next(ks), shape, jnp.float32) * 0.02).astype(wdt)
    zeros = lambda *shape: jnp.zeros(shape, jnp.float32)
    ones = lambda *shape: jnp.ones(shape, jnp.float32)
    E, H, I, C = cfg["emb_size"], cfg["hidden"], cfg["inter"], cfg["num_labels"]
    q_w, k_w, v_w = n(H, H), n(H, H), n(H, H)
    p = {
        "word_emb": n(cfg["vocab_size"], E),
        "pos_emb": n(cfg["max_pos"], E),
        "type_emb": n(cfg["type_vocab"], E),
        "emb_ln_g": ones(1, E), "emb_ln_b": zeros(1, E),
        "map_w": n(E, H), "map_b": zeros(1, H),
        # single shared ALBERT layer (parameter sharing across num_layers)
        "layer": {
            "qkv_w": jnp.concatenate([q_w, k_w, v_w], axis=1),   # (H, 3H) packed QKV
            "qkv_b": zeros(1, 3 * H),
            "ao_w": n(H, H), "ao_b": zeros(1, H),
            "attn_ln_g": ones(1, H), "attn_ln_b": zeros(1, H),
            "ffn_w": n(H, I), "ffn_b": zeros(1, I),
            "ffn_out_w": n(I, H), "ffn_out_b": zeros(1, H),
            "ffn_ln_g": ones(1, H), "ffn_ln_b": zeros(1, H),
        },
        "pool_w": n(H, H), "pool_b": zeros(1, H),
        "cls_w": n(H, C), "cls_b": zeros(1, C),
    }
    return p


def albert_forward(params, input_ids, attention_mask, token_type_ids, labels, cfg=CFG):
    B, S = input_ids.shape
    E, H = cfg["emb_size"], cfg["hidden"]

    # Embedding gathers are plain-JAX glue.
    we = jnp.take(params["word_emb"], input_ids, axis=0)                 # (B,S,E)
    pe = jnp.take(params["pos_emb"], jnp.arange(S), axis=0)[None]        # (1,S,E)
    te = jnp.take(params["type_emb"], token_type_ids, axis=0)            # (B,S,E)
    emb = (we + pe + te).reshape(B * S, E)

    # Fused embedding layernorm + factorized embedding->hidden projection.
    h = pallas_emb_ln_proj(emb, params["emb_ln_g"], params["emb_ln_b"],
                           params["map_w"], params["map_b"])             # (B*S, H) bf16
    h = h.reshape(B, S, H)

    # Additive attention mask (B,1,S), kept in f32.
    ext_mask = (1.0 - attention_mask.astype(jnp.float32))[:, None, :] * -10000.0

    # Whole encoder stack (shared ALBERT layer applied num_layers times) in ONE
    # pallas_call: weights stay VMEM-resident, hidden state never leaves VMEM.
    h = pallas_albert_encoder(h, ext_mask, params["layer"], cfg["num_layers"], cfg)

    pooled_in = h[:, 0, :]                                               # (B, H) bf16

    # Fused pooler + classifier + softmax + mean cross-entropy (matches
    # nn.CrossEntropyLoss + functional.softmax).
    logits, probabilities, loss = pallas_cls_head(
        pooled_in, params["pool_w"], params["pool_b"],
        params["cls_w"], params["cls_b"],
        labels.reshape(B, 1).astype(jnp.int32))
    return loss[0, 0], logits, probabilities


# --------------------------------------------------------------------------------------
if __name__ == "__main__":
    B, S = 2, 8
    key = jax.random.PRNGKey(0)
    k_par, k_ids, k_lab = jax.random.split(key, 3)

    params = init_params(k_par, CFG)

    batch_seqs = jax.random.randint(k_ids, (B, S), 0, CFG["vocab_size"], dtype=jnp.int32)
    batch_seq_masks = jnp.array([[1, 1, 1, 1, 1, 1, 1, 1],
                                 [1, 1, 1, 1, 1, 1, 0, 0]], dtype=jnp.int32)
    batch_seq_segments = jnp.zeros((B, S), dtype=jnp.int32)
    labels = jax.random.randint(k_lab, (B,), 0, CFG["num_labels"], dtype=jnp.int32)

    fwd = jax.jit(functools.partial(albert_forward, cfg=CFG))
    loss, logits, probs = fwd(params, batch_seqs, batch_seq_masks,
                              batch_seq_segments, labels)
    jax.block_until_ready((loss, logits, probs))

    assert logits.shape == (B, CFG["num_labels"])
    assert probs.shape == (B, CFG["num_labels"])
    assert bool(jnp.isfinite(loss))
    assert bool(jnp.all(jnp.isfinite(logits)))
    assert bool(jnp.allclose(jnp.sum(probs, axis=-1), 1.0, atol=1e-5))
    print("KERNEL_OK")
</pallas_src>

<mosaic_0001>
module attributes {stable_mosaic.version = 11 : i64} {
  func.func @head_kernel(%arg0: i32, %arg1: memref<2x32xbf16, #tpu.memory_space<vmem>>, %arg2: memref<32x32xbf16, #tpu.memory_space<vmem>>, %arg3: memref<1x32xf32, #tpu.memory_space<vmem>>, %arg4: memref<32x2xbf16, #tpu.memory_space<vmem>>, %arg5: memref<1x2xf32, #tpu.memory_space<vmem>>, %arg6: memref<2x1xi32, #tpu.memory_space<vmem>>, %arg7: memref<2x2xf32, #tpu.memory_space<vmem>>, %arg8: memref<2x2xf32, #tpu.memory_space<vmem>>, %arg9: memref<1x1xf32, #tpu.memory_space<vmem>>) attributes {dimension_semantics = [#tpu.dimension_semantics<arbitrary>], iteration_bounds = array<i64: 1>, scalar_prefetch = 0 : i64, scratch_operands = 0 : i64, tpu.core_type = #tpu.core_type<tc>, window_params = [{pipeline_mode = #tpu.pipeline_mode<synchronous>, transform_indices = @transform_0, window_bounds = array<i64: 2, 32>}, {pipeline_mode = #tpu.pipeline_mode<synchronous>, transform_indices = @transform_1, window_bounds = array<i64: 32, 32>}, {pipeline_mode = #tpu.pipeline_mode<synchronous>, transform_indices = @transform_2, window_bounds = array<i64: 1, 32>}, {pipeline_mode = #tpu.pipeline_mode<synchronous>, transform_indices = @transform_3, window_bounds = array<i64: 32, 2>}, {pipeline_mode = #tpu.pipeline_mode<synchronous>, transform_indices = @transform_4, window_bounds = array<i64: 1, 2>}, {pipeline_mode = #tpu.pipeline_mode<synchronous>, transform_indices = @transform_5, window_bounds = array<i64: 2, 1>}, {pipeline_mode = #tpu.pipeline_mode<synchronous>, transform_indices = @transform_6, window_bounds = array<i64: 2, 2>}, {pipeline_mode = #tpu.pipeline_mode<synchronous>, transform_indices = @transform_7, window_bounds = array<i64: 2, 2>}, {pipeline_mode = #tpu.pipeline_mode<synchronous>, transform_indices = @transform_8, window_bounds = array<i64: 1, 1>}]} {
    %c0 = arith.constant 0 : index
    %c0_0 = arith.constant 0 : index
    %0 = vector.load %arg1[%c0, %c0_0] : memref<2x32xbf16, #tpu.memory_space<vmem>>, vector<2x32xbf16>
    %c0_1 = arith.constant 0 : index
    %c0_2 = arith.constant 0 : index
    %1 = vector.load %arg2[%c0_1, %c0_2] : memref<32x32xbf16, #tpu.memory_space<vmem>>, vector<32x32xbf16>
    %cst = arith.constant dense<0.000000e+00> : vector<2x32xf32>
    %2 = tpu.matmul %0, %1, %cst {dimension_numbers = #tpu.dot_dimension_numbers<[1], [0], [0], [1], [0, 0, 1, 1], [], []>} : vector<2x32xbf16>, vector<32x32xbf16>, vector<2x32xf32> -> vector<2x32xf32>
    %c0_3 = arith.constant 0 : index
    %c0_4 = arith.constant 0 : index
    %3 = vector.load %arg3[%c0_3, %c0_4] : memref<1x32xf32, #tpu.memory_space<vmem>>, vector<1x32xf32>
    %4 = vector.broadcast %3 : vector<1x32xf32> to vector<2x32xf32>
    %5 = arith.addf %2, %4 : vector<2x32xf32>
    %6 = math.tanh %5 : vector<2x32xf32>
    %7 = arith.truncf %6 : vector<2x32xf32> to vector<2x32xbf16>
    %c0_5 = arith.constant 0 : index
    %c0_6 = arith.constant 0 : index
    %8 = vector.load %arg4[%c0_5, %c0_6] : memref<32x2xbf16, #tpu.memory_space<vmem>>, vector<32x2xbf16>
    %cst_7 = arith.constant dense<0.000000e+00> : vector<2x2xf32>
    %9 = tpu.matmul %7, %8, %cst_7 {dimension_numbers = #tpu.dot_dimension_numbers<[1], [0], [0], [1], [0, 0, 1, 1], [], []>} : vector<2x32xbf16>, vector<32x2xbf16>, vector<2x2xf32> -> vector<2x2xf32>
    %c0_8 = arith.constant 0 : index
    %c0_9 = arith.constant 0 : index
    %10 = vector.load %arg5[%c0_8, %c0_9] : memref<1x2xf32, #tpu.memory_space<vmem>>, vector<1x2xf32>
    %11 = vector.broadcast %10 : vector<1x2xf32> to vector<2x2xf32>
    %12 = arith.addf %9, %11 : vector<2x2xf32>
    %cst_10 = arith.constant dense<0xFF800000> : vector<2xf32>
    %13 = vector.multi_reduction <maximumf>, %12, %cst_10 [1] : vector<2x2xf32> to vector<2xf32>
    %14 = vector.shape_cast %13 : vector<2xf32> to vector<2x1xf32>
    %15 = vector.broadcast %14 : vector<2x1xf32> to vector<2x2xf32>
    %16 = arith.subf %12, %15 : vector<2x2xf32>
    %17 = math.exp %16 : vector<2x2xf32>
    %cst_11 = arith.constant dense<0.000000e+00> : vector<2xf32>
    %18 = vector.multi_reduction <add>, %17, %cst_11 [1] : vector<2x2xf32> to vector<2xf32>
    %19 = vector.shape_cast %18 : vector<2xf32> to vector<2x1xf32>
    %c0_12 = arith.constant 0 : index
    %c0_13 = arith.constant 0 : index
    %20 = vector.load %arg7[%c0_12, %c0_13] : memref<2x2xf32, #tpu.memory_space<vmem>>, vector<2x2xf32>
    tpu.vector_store %arg7[%c0_12, %c0_13], %12 {strides = array<i32>} : memref<2x2xf32, #tpu.memory_space<vmem>>, vector<2x2xf32>,
    %21 = vector.broadcast %19 : vector<2x1xf32> to vector<2x2xf32>
    %22 = arith.divf %17, %21 : vector<2x2xf32>
    %c0_14 = arith.constant 0 : index
    %c0_15 = arith.constant 0 : index
    %23 = vector.load %arg8[%c0_14, %c0_15] : memref<2x2xf32, #tpu.memory_space<vmem>>, vector<2x2xf32>
    tpu.vector_store %arg8[%c0_14, %c0_15], %22 {strides = array<i32>} : memref<2x2xf32, #tpu.memory_space<vmem>>, vector<2x2xf32>,
    %c0_16 = arith.constant 0 : index
    %c0_17 = arith.constant 0 : index
    %24 = vector.load %arg6[%c0_16, %c0_17] : memref<2x1xi32, #tpu.memory_space<vmem>>, vector<2x1xi32>
    %25 = tpu.iota {dimensions = array<i32: 1>} : vector<2x2xi32>
    %26 = vector.broadcast %24 : vector<2x1xi32> to vector<2x2xi32>
    %27 = arith.cmpi eq, %25, %26 : vector<2x2xi32>
    %28 = arith.extui %27 : vector<2x2xi1> to vector<2x2xi32>
    %29 = arith.sitofp %28 : vector<2x2xi32> to vector<2x2xf32>
    %30 = vector.broadcast %14 : vector<2x1xf32> to vector<2x2xf32>
    %31 = arith.subf %12, %30 : vector<2x2xf32>
    %32 = math.log %19 : vector<2x1xf32>
    %33 = vector.broadcast %32 : vector<2x1xf32> to vector<2x2xf32>
    %34 = arith.subf %31, %33 : vector<2x2xf32>
    %35 = arith.mulf %29, %34 : vector<2x2xf32>
    %cst_18 = arith.constant dense<0.000000e+00> : vector<2xf32>
    %36 = vector.multi_reduction <add>, %35, %cst_18 [1] : vector<2x2xf32> to vector<2xf32>
    %37 = vector.shape_cast %36 : vector<2xf32> to vector<2x1xf32>
    %cst_19 = arith.constant 0.000000e+00 : f32
    %38 = vector.broadcast %cst_19 : f32 to vector<2x1xf32>
    %39 = arith.subf %38, %37 : vector<2x1xf32>
    %40 = vector.shape_cast %39 : vector<2x1xf32> to vector<1x2x1xf32>
    %cst_20 = arith.constant dense<0.000000e+00> : vector<1xf32>
    %41 = vector.multi_reduction <add>, %40, %cst_20 [1, 2] : vector<1x2x1xf32> to vector<1xf32>
    %42 = vector.shape_cast %41 : vector<1xf32> to vector<1x1x1xf32>
    %43 = vector.extract %42[0, 0, 0] : f32 from vector<1x1x1xf32>
    %44 = vector.broadcast %43 : f32 to vector<1x1xf32>
    %cst_21 = arith.constant 2.000000e+00 : f32
    %45 = vector.broadcast %cst_21 : f32 to vector<1x1xf32>
    %46 = arith.divf %44, %45 : vector<1x1xf32>
    %c0_22 = arith.constant 0 : index
    %c0_23 = arith.constant 0 : index
    %47 = vector.load %arg9[%c0_22, %c0_23] : memref<1x1xf32, #tpu.memory_space<vmem>>, vector<1x1xf32>
    tpu.vector_store %arg9[%c0_22, %c0_23], %46 {strides = array<i32>} : memref<1x1xf32, #tpu.memory_space<vmem>>, vector<1x1xf32>,
    return
  }
  func.func @transform_0(%arg0: i32) -> (i32, i32) {
    %c0_i32 = arith.constant 0 : i32
    %c0_i32_0 = arith.constant 0 : i32
    %c0_i32_1 = arith.constant 0 : i32
    return %c0_i32, %c0_i32_0 : i32, i32
  }
  func.func @transform_1(%arg0: i32) -> (i32, i32) {
    %c0_i32 = arith.constant 0 : i32
    %c0_i32_0 = arith.constant 0 : i32
    %c0_i32_1 = arith.constant 0 : i32
    return %c0_i32, %c0_i32_0 : i32, i32
  }
  func.func @transform_2(%arg0: i32) -> (i32, i32) {
    %c0_i32 = arith.constant 0 : i32
    %c0_i32_0 = arith.constant 0 : i32
    %c0_i32_1 = arith.constant 0 : i32
    return %c0_i32, %c0_i32_0 : i32, i32
  }
  func.func @transform_3(%arg0: i32) -> (i32, i32) {
    %c0_i32 = arith.constant 0 : i32
    %c0_i32_0 = arith.constant 0 : i32
    %c0_i32_1 = arith.constant 0 : i32
    return %c0_i32, %c0_i32_0 : i32, i32
  }
  func.func @transform_4(%arg0: i32) -> (i32, i32) {
    %c0_i32 = arith.constant 0 : i32
    %c0_i32_0 = arith.constant 0 : i32
    %c0_i32_1 = arith.constant 0 : i32
    return %c0_i32, %c0_i32_0 : i32, i32
  }
  func.func @transform_5(%arg0: i32) -> (i32, i32) {
    %c0_i32 = arith.constant 0 : i32
    %c0_i32_0 = arith.constant 0 : i32
    %c0_i32_1 = arith.constant 0 : i32
    return %c0_i32, %c0_i32_0 : i32, i32
  }
  func.func @transform_6(%arg0: i32) -> (i32, i32) {
    %c0_i32 = arith.constant 0 : i32
    %c0_i32_0 = arith.constant 0 : i32
    %c0_i32_1 = arith.constant 0 : i32
    return %c0_i32, %c0_i32_0 : i32, i32
  }
  func.func @transform_7(%arg0: i32) -> (i32, i32) {
    %c0_i32 = arith.constant 0 : i32
    %c0_i32_0 = arith.constant 0 : i32
    %c0_i32_1 = arith.constant 0 : i32
    return %c0_i32, %c0_i32_0 : i32, i32
  }
  func.func @transform_8(%arg0: i32) -> (i32, i32) {
    %c0_i32 = arith.constant 0 : i32
    %c0_i32_0 = arith.constant 0 : i32
    %c0_i32_1 = arith.constant 0 : i32
    return %c0_i32, %c0_i32_0 : i32, i32
  }
}

module attributes {stable_mosaic.version = 11 : i64} {
  func.func @emb_ln_proj_kernel(%arg0: i32, %arg1: memref<16x16xbf16, #tpu.memory_space<vmem>>, %arg2: memref<1x16xf32, #tpu.memory_space<vmem>>, %arg3: memref<1x16xf32, #tpu.memory_space<vmem>>, %arg4: memref<16x32xbf16, #tpu.memory_space<vmem>>, %arg5: memref<1x32xf32, #tpu.memory_space<vmem>>, %arg6: memref<16x32xbf16, #tpu.memory_space<vmem>>) attributes {dimension_semantics = [#tpu.dimension_semantics<parallel>], iteration_bounds = array<i64: 1>, scalar_prefetch = 0 : i64, scratch_operands = 0 : i64, tpu.core_type = #tpu.core_type<tc>, window_params = [{transform_indices = @transform_0, window_bounds = array<i64: 16, 16>}, {pipeline_mode = #tpu.pipeline_mode<synchronous>, transform_indices = @transform_1, window_bounds = array<i64: 1, 16>}, {pipeline_mode = #tpu.pipeline_mode<synchronous>, transform_indices = @transform_2, window_bounds = array<i64: 1, 16>}, {pipeline_mode = #tpu.pipeline_mode<synchronous>, transform_indices = @transform_3, window_bounds = array<i64: 16, 32>}, {pipeline_mode = #tpu.pipeline_mode<synchronous>, transform_indices = @transform_4, window_bounds = array<i64: 1, 32>}, {transform_indices = @transform_5, window_bounds = array<i64: 16, 32>}]} {
    %c0 = arith.constant 0 : index
    %c0_0 = arith.constant 0 : index
    %0 = vector.load %arg1[%c0, %c0_0] : memref<16x16xbf16, #tpu.memory_space<vmem>>, vector<16x16xbf16>
    %1 = arith.extf %0 : vector<16x16xbf16> to vector<16x16xf32>
    %cst = arith.constant dense<0.000000e+00> : vector<16xf32>
    %2 = vector.multi_reduction <add>, %1, %cst [1] : vector<16x16xf32> to vector<16xf32>
    %3 = vector.shape_cast %2 : vector<16xf32> to vector<16x1xf32>
    %cst_1 = arith.constant 1.600000e+01 : f32
    %4 = vector.broadcast %cst_1 : f32 to vector<16x1xf32>
    %5 = arith.divf %3, %4 : vector<16x1xf32>
    %6 = vector.broadcast %5 : vector<16x1xf32> to vector<16x16xf32>
    %7 = arith.subf %1, %6 : vector<16x16xf32>
    %8 = vector.broadcast %5 : vector<16x1xf32> to vector<16x16xf32>
    %9 = arith.subf %1, %8 : vector<16x16xf32>
    %10 = arith.mulf %7, %9 : vector<16x16xf32>
    %cst_2 = arith.constant dense<0.000000e+00> : vector<16xf32>
    %11 = vector.multi_reduction <add>, %10, %cst_2 [1] : vector<16x16xf32> to vector<16xf32>
    %12 = vector.shape_cast %11 : vector<16xf32> to vector<16x1xf32>
    %cst_3 = arith.constant 1.600000e+01 : f32
    %13 = vector.broadcast %cst_3 : f32 to vector<16x1xf32>
    %14 = arith.divf %12, %13 : vector<16x1xf32>
    %15 = vector.broadcast %5 : vector<16x1xf32> to vector<16x16xf32>
    %16 = arith.subf %1, %15 : vector<16x16xf32>
    %cst_4 = arith.constant 9.99999996E-13 : f32
    %17 = vector.broadcast %cst_4 : f32 to vector<16x1xf32>
    %18 = arith.addf %14, %17 : vector<16x1xf32>
    %19 = math.rsqrt %18 : vector<16x1xf32>
    %20 = vector.broadcast %19 : vector<16x1xf32> to vector<16x16xf32>
    %21 = arith.mulf %16, %20 : vector<16x16xf32>
    %c0_5 = arith.constant 0 : index
    %c0_6 = arith.constant 0 : index
    %22 = vector.load %arg2[%c0_5, %c0_6] : memref<1x16xf32, #tpu.memory_space<vmem>>, vector<1x16xf32>
    %23 = vector.broadcast %22 : vector<1x16xf32> to vector<16x16xf32>
    %24 = arith.mulf %21, %23 : vector<16x16xf32>
    %c0_7 = arith.constant 0 : index
    %c0_8 = arith.constant 0 : index
    %25 = vector.load %arg3[%c0_7, %c0_8] : memref<1x16xf32, #tpu.memory_space<vmem>>, vector<1x16xf32>
    %26 = vector.broadcast %25 : vector<1x16xf32> to vector<16x16xf32>
    %27 = arith.addf %24, %26 : vector<16x16xf32>
    %28 = arith.truncf %27 : vector<16x16xf32> to vector<16x16xbf16>
    %c0_9 = arith.constant 0 : index
    %c0_10 = arith.constant 0 : index
    %29 = vector.load %arg4[%c0_9, %c0_10] : memref<16x32xbf16, #tpu.memory_space<vmem>>, vector<16x32xbf16>
    %cst_11 = arith.constant dense<0.000000e+00> : vector<16x32xf32>
    %30 = tpu.matmul %28, %29, %cst_11 {dimension_numbers = #tpu.dot_dimension_numbers<[1], [0], [0], [1], [0, 0, 1, 1], [], []>} : vector<16x16xbf16>, vector<16x32xbf16>, vector<16x32xf32> -> vector<16x32xf32>
    %c0_12 = arith.constant 0 : index
    %c0_13 = arith.constant 0 : index
    %31 = vector.load %arg5[%c0_12, %c0_13] : memref<1x32xf32, #tpu.memory_space<vmem>>, vector<1x32xf32>
    %32 = vector.broadcast %31 : vector<1x32xf32> to vector<16x32xf32>
    %33 = arith.addf %30, %32 : vector<16x32xf32>
    %34 = arith.truncf %33 : vector<16x32xf32> to vector<16x32xbf16>
    %c0_14 = arith.constant 0 : index
    %c0_15 = arith.constant 0 : index
    %35 = vector.load %arg6[%c0_14, %c0_15] : memref<16x32xbf16, #tpu.memory_space<vmem>>, vector<16x32xbf16>
    tpu.vector_store %arg6[%c0_14, %c0_15], %34 {strides = array<i32>} : memref<16x32xbf16, #tpu.memory_space<vmem>>, vector<16x32xbf16>,
    return
  }
  func.func @transform_0(%arg0: i32) -> (i32, i32) {
    %c0_i32 = arith.constant 0 : i32
    %c0_i32_0 = arith.constant 0 : i32
    return %arg0, %c0_i32 : i32, i32
  }
  func.func @transform_1(%arg0: i32) -> (i32, i32) {
    %c0_i32 = arith.constant 0 : i32
    %c0_i32_0 = arith.constant 0 : i32
    %c0_i32_1 = arith.constant 0 : i32
    return %c0_i32, %c0_i32_0 : i32, i32
  }
  func.func @transform_2(%arg0: i32) -> (i32, i32) {
    %c0_i32 = arith.constant 0 : i32
    %c0_i32_0 = arith.constant 0 : i32
    %c0_i32_1 = arith.constant 0 : i32
    return %c0_i32, %c0_i32_0 : i32, i32
  }
  func.func @transform_3(%arg0: i32) -> (i32, i32) {
    %c0_i32 = arith.constant 0 : i32
    %c0_i32_0 = arith.constant 0 : i32
    %c0_i32_1 = arith.constant 0 : i32
    return %c0_i32, %c0_i32_0 : i32, i32
  }
  func.func @transform_4(%arg0: i32) -> (i32, i32) {
    %c0_i32 = arith.constant 0 : i32
    %c0_i32_0 = arith.constant 0 : i32
    %c0_i32_1 = arith.constant 0 : i32
    return %c0_i32, %c0_i32_0 : i32, i32
  }
  func.func @transform_5(%arg0: i32) -> (i32, i32) {
    %c0_i32 = arith.constant 0 : i32
    %c0_i32_0 = arith.constant 0 : i32
    return %arg0, %c0_i32 : i32, i32
  }
}

module attributes {stable_mosaic.version = 11 : i64} {
  func.func @albert_encoder_kernel(%arg0: i32, %arg1: i32, %arg2: memref<1x8x32xbf16, #tpu.memory_space<vmem>>, %arg3: memref<1x1x8xf32, #tpu.memory_space<vmem>>, %arg4: memref<32x96xbf16, #tpu.memory_space<vmem>>, %arg5: memref<1x96xf32, #tpu.memory_space<vmem>>, %arg6: memref<32x32xbf16, #tpu.memory_space<vmem>>, %arg7: memref<1x32xf32, #tpu.memory_space<vmem>>, %arg8: memref<1x32xf32, #tpu.memory_space<vmem>>, %arg9: memref<1x32xf32, #tpu.memory_space<vmem>>, %arg10: memref<32x64xbf16, #tpu.memory_space<vmem>>, %arg11: memref<1x64xf32, #tpu.memory_space<vmem>>, %arg12: memref<64x32xbf16, #tpu.memory_space<vmem>>, %arg13: memref<1x32xf32, #tpu.memory_space<vmem>>, %arg14: memref<1x32xf32, #tpu.memory_space<vmem>>, %arg15: memref<1x32xf32, #tpu.memory_space<vmem>>, %arg16: memref<1x8x32xbf16, #tpu.memory_space<vmem>>) attributes {dimension_semantics = [#tpu.dimension_semantics<parallel>, #tpu.dimension_semantics<arbitrary>], iteration_bounds = array<i64: 2, 2>, scalar_prefetch = 0 : i64, scratch_operands = 0 : i64, tpu.core_type = #tpu.core_type<tc>, window_params = [{transform_indices = @transform_0, window_bounds = array<i64: 1, 8, 32>}, {transform_indices = @transform_1, window_bounds = array<i64: 1, 1, 8>}, {pipeline_mode = #tpu.pipeline_mode<synchronous>, transform_indices = @transform_2, window_bounds = array<i64: 32, 96>}, {pipeline_mode = #tpu.pipeline_mode<synchronous>, transform_indices = @transform_3, window_bounds = array<i64: 1, 96>}, {pipeline_mode = #tpu.pipeline_mode<synchronous>, transform_indices = @transform_4, window_bounds = array<i64: 32, 32>}, {pipeline_mode = #tpu.pipeline_mode<synchronous>, transform_indices = @transform_5, window_bounds = array<i64: 1, 32>}, {pipeline_mode = #tpu.pipeline_mode<synchronous>, transform_indices = @transform_6, window_bounds = array<i64: 1, 32>}, {pipeline_mode = #tpu.pipeline_mode<synchronous>, transform_indices = @transform_7, window_bounds = array<i64: 1, 32>}, {pipeline_mode = #tpu.pipeline_mode<synchronous>, transform_indices = @transform_8, window_bounds = array<i64: 32, 64>}, {pipeline_mode = #tpu.pipeline_mode<synchronous>, transform_indices = @transform_9, window_bounds = array<i64: 1, 64>}, {pipeline_mode = #tpu.pipeline_mode<synchronous>, transform_indices = @transform_10, window_bounds = array<i64: 64, 32>}, {pipeline_mode = #tpu.pipeline_mode<synchronous>, transform_indices = @transform_11, window_bounds = array<i64: 1, 32>}, {pipeline_mode = #tpu.pipeline_mode<synchronous>, transform_indices = @transform_12, window_bounds = array<i64: 1, 32>}, {pipeline_mode = #tpu.pipeline_mode<synchronous>, transform_indices = @transform_13, window_bounds = array<i64: 1, 32>}, {transform_indices = @transform_14, window_bounds = array<i64: 1, 8, 32>}]} {
    %c0_i32 = arith.constant 0 : i32
    %0 = arith.cmpi eq, %arg1, %c0_i32 : i32
    %1 = arith.extui %0 : i1 to i32
    %c0_i32_0 = arith.constant 0 : i32
    %2 = arith.cmpi ne, %1, %c0_i32_0 : i32
    scf.if %2 {
      %c0_70 = arith.constant 0 : index
      %c0_71 = arith.constant 0 : index
      %c0_72 = arith.constant 0 : index
      %184 = vector.load %arg2[%c0_70, %c0_71, %c0_72] : memref<1x8x32xbf16, #tpu.memory_space<vmem>>, vector<1x8x32xbf16>
      %c0_73 = arith.constant 0 : index
      %c0_74 = arith.constant 0 : index
      %c0_75 = arith.constant 0 : index
      %185 = vector.load %arg16[%c0_73, %c0_74, %c0_75] : memref<1x8x32xbf16, #tpu.memory_space<vmem>>, vector<1x8x32xbf16>
      tpu.vector_store %arg16[%c0_73, %c0_74, %c0_75], %184 {strides = array<i32>} : memref<1x8x32xbf16, #tpu.memory_space<vmem>>, vector<1x8x32xbf16>,
    } else {
    }
    %c0 = arith.constant 0 : index
    %c0_1 = arith.constant 0 : index
    %c0_2 = arith.constant 0 : index
    %3 = vector.load %arg16[%c0, %c0_1, %c0_2] : memref<1x8x32xbf16, #tpu.memory_space<vmem>>, vector<1x8x32xbf16>
    %4 = vector.shape_cast %3 : vector<1x8x32xbf16> to vector<8x32xbf16>
    %5 = arith.extf %4 : vector<8x32xbf16> to vector<8x32xf32>
    %c0_3 = arith.constant 0 : index
    %c0_4 = arith.constant 0 : index
    %c0_5 = arith.constant 0 : index
    %6 = vector.load %arg3[%c0_3, %c0_4, %c0_5] : memref<1x1x8xf32, #tpu.memory_space<vmem>>, vector<1x1x8xf32>
    %7 = vector.shape_cast %6 : vector<1x1x8xf32> to vector<1x8xf32>
    %c0_6 = arith.constant 0 : index
    %c0_7 = arith.constant 0 : index
    %8 = vector.load %arg4[%c0_6, %c0_7] : memref<32x96xbf16, #tpu.memory_space<vmem>>, vector<32x96xbf16>
    %cst = arith.constant dense<0.000000e+00> : vector<8x96xf32>
    %9 = tpu.matmul %4, %8, %cst {dimension_numbers = #tpu.dot_dimension_numbers<[1], [0], [0], [1], [0, 0, 1, 1], [], []>} : vector<8x32xbf16>, vector<32x96xbf16>, vector<8x96xf32> -> vector<8x96xf32>
    %c0_8 = arith.constant 0 : index
    %c0_9 = arith.constant 0 : index
    %10 = vector.load %arg5[%c0_8, %c0_9] : memref<1x96xf32, #tpu.memory_space<vmem>>, vector<1x96xf32>
    %11 = vector.broadcast %10 : vector<1x96xf32> to vector<8x96xf32>
    %12 = arith.addf %9, %11 : vector<8x96xf32>
    %13 = arith.truncf %12 : vector<8x96xf32> to vector<8x96xbf16>
    %14 = vector.extract_strided_slice %13 {offsets = [0, 0], sizes = [8, 8], strides = [1, 1]} : vector<8x96xbf16> to vector<8x8xbf16>
    %15 = vector.extract_strided_slice %13 {offsets = [0, 32], sizes = [8, 8], strides = [1, 1]} : vector<8x96xbf16> to vector<8x8xbf16>
    %16 = vector.extract_strided_slice %13 {offsets = [0, 64], sizes = [8, 8], strides = [1, 1]} : vector<8x96xbf16> to vector<8x8xbf16>
    %cst_10 = arith.constant dense<0.000000e+00> : vector<8x8xf32>
    %17 = tpu.matmul %14, %15, %cst_10 {dimension_numbers = #tpu.dot_dimension_numbers<[1], [1], [0], [0], [0, 0, 1, 0], [], []>} : vector<8x8xbf16>, vector<8x8xbf16>, vector<8x8xf32> -> vector<8x8xf32>
    %cst_11 = arith.constant 0.353553385 : f32
    %18 = vector.broadcast %cst_11 : f32 to vector<8x8xf32>
    %19 = arith.mulf %17, %18 : vector<8x8xf32>
    %20 = vector.broadcast %7 : vector<1x8xf32> to vector<8x8xf32>
    %21 = arith.addf %19, %20 : vector<8x8xf32>
    %cst_12 = arith.constant dense<0xFF800000> : vector<8xf32>
    %22 = vector.multi_reduction <maximumf>, %21, %cst_12 [1] : vector<8x8xf32> to vector<8xf32>
    %23 = vector.shape_cast %22 : vector<8xf32> to vector<8x1xf32>
    %24 = vector.broadcast %23 : vector<8x1xf32> to vector<8x8xf32>
    %25 = arith.subf %21, %24 : vector<8x8xf32>
    %26 = math.exp %25 : vector<8x8xf32>
    %cst_13 = arith.constant dense<0.000000e+00> : vector<8xf32>
    %27 = vector.multi_reduction <add>, %26, %cst_13 [1] : vector<8x8xf32> to vector<8xf32>
    %28 = vector.shape_cast %27 : vector<8xf32> to vector<8x1xf32>
    %29 = tpu.reciprocal %28 {approx = true} : vector<8x1xf32> -> vector<8x1xf32>
    %30 = vector.broadcast %29 : vector<8x1xf32> to vector<8x8xf32>
    %31 = arith.mulf %26, %30 : vector<8x8xf32>
    %32 = arith.truncf %31 : vector<8x8xf32> to vector<8x8xbf16>
    %cst_14 = arith.constant dense<0.000000e+00> : vector<8x8xf32>
    %33 = tpu.matmul %32, %16, %cst_14 {dimension_numbers = #tpu.dot_dimension_numbers<[1], [0], [0], [1], [0, 0, 1, 1], [], []>} : vector<8x8xbf16>, vector<8x8xbf16>, vector<8x8xf32> -> vector<8x8xf32>
    %34 = vector.extract_strided_slice %13 {offsets = [0, 8], sizes = [8, 8], strides = [1, 1]} : vector<8x96xbf16> to vector<8x8xbf16>
    %35 = vector.extract_strided_slice %13 {offsets = [0, 40], sizes = [8, 8], strides = [1, 1]} : vector<8x96xbf16> to vector<8x8xbf16>
    %36 = vector.extract_strided_slice %13 {offsets = [0, 72], sizes = [8, 8], strides = [1, 1]} : vector<8x96xbf16> to vector<8x8xbf16>
    %cst_15 = arith.constant dense<0.000000e+00> : vector<8x8xf32>
    %37 = tpu.matmul %34, %35, %cst_15 {dimension_numbers = #tpu.dot_dimension_numbers<[1], [1], [0], [0], [0, 0, 1, 0], [], []>} : vector<8x8xbf16>, vector<8x8xbf16>, vector<8x8xf32> -> vector<8x8xf32>
    %cst_16 = arith.constant 0.353553385 : f32
    %38 = vector.broadcast %cst_16 : f32 to vector<8x8xf32>
    %39 = arith.mulf %37, %38 : vector<8x8xf32>
    %40 = vector.broadcast %7 : vector<1x8xf32> to vector<8x8xf32>
    %41 = arith.addf %39, %40 : vector<8x8xf32>
    %cst_17 = arith.constant dense<0xFF800000> : vector<8xf32>
    %42 = vector.multi_reduction <maximumf>, %41, %cst_17 [1] : vector<8x8xf32> to vector<8xf32>
    %43 = vector.shape_cast %42 : vector<8xf32> to vector<8x1xf32>
    %44 = vector.broadcast %43 : vector<8x1xf32> to vector<8x8xf32>
    %45 = arith.subf %41, %44 : vector<8x8xf32>
    %46 = math.exp %45 : vector<8x8xf32>
    %cst_18 = arith.constant dense<0.000000e+00> : vector<8xf32>
    %47 = vector.multi_reduction <add>, %46, %cst_18 [1] : vector<8x8xf32> to vector<8xf32>
    %48 = vector.shape_cast %47 : vector<8xf32> to vector<8x1xf32>
    %49 = tpu.reciprocal %48 {approx = true} : vector<8x1xf32> -> vector<8x1xf32>
    %50 = vector.broadcast %49 : vector<8x1xf32> to vector<8x8xf32>
    %51 = arith.mulf %46, %50 : vector<8x8xf32>
    %52 = arith.truncf %51 : vector<8x8xf32> to vector<8x8xbf16>
    %cst_19 = arith.constant dense<0.000000e+00> : vector<8x8xf32>
    %53 = tpu.matmul %52, %36, %cst_19 {dimension_numbers = #tpu.dot_dimension_numbers<[1], [0], [0], [1], [0, 0, 1, 1], [], []>} : vector<8x8xbf16>, vector<8x8xbf16>, vector<8x8xf32> -> vector<8x8xf32>
    %54 = vector.extract_strided_slice %13 {offsets = [0, 16], sizes = [8, 8], strides = [1, 1]} : vector<8x96xbf16> to vector<8x8xbf16>
    %55 = vector.extract_strided_slice %13 {offsets = [0, 48], sizes = [8, 8], strides = [1, 1]} : vector<8x96xbf16> to vector<8x8xbf16>
    %56 = vector.extract_strided_slice %13 {offsets = [0, 80], sizes = [8, 8], strides = [1, 1]} : vector<8x96xbf16> to vector<8x8xbf16>
    %cst_20 = arith.constant dense<0.000000e+00> : vector<8x8xf32>
    %57 = tpu.matmul %54, %55, %cst_20 {dimension_numbers = #tpu.dot_dimension_numbers<[1], [1], [0], [0], [0, 0, 1, 0], [], []>} : vector<8x8xbf16>, vector<8x8xbf16>, vector<8x8xf32> -> vector<8x8xf32>
    %cst_21 = arith.constant 0.353553385 : f32
    %58 = vector.broadcast %cst_21 : f32 to vector<8x8xf32>
    %59 = arith.mulf %57, %58 : vector<8x8xf32>
    %60 = vector.broadcast %7 : vector<1x8xf32> to vector<8x8xf32>
    %61 = arith.addf %59, %60 : vector<8x8xf32>
    %cst_22 = arith.constant dense<0xFF800000> : vector<8xf32>
    %62 = vector.multi_reduction <maximumf>, %61, %cst_22 [1] : vector<8x8xf32> to vector<8xf32>
    %63 = vector.shape_cast %62 : vector<8xf32> to vector<8x1xf32>
    %64 = vector.broadcast %63 : vector<8x1xf32> to vector<8x8xf32>
    %65 = arith.subf %61, %64 : vector<8x8xf32>
    %66 = math.exp %65 : vector<8x8xf32>
    %cst_23 = arith.constant dense<0.000000e+00> : vector<8xf32>
    %67 = vector.multi_reduction <add>, %66, %cst_23 [1] : vector<8x8xf32> to vector<8xf32>
    %68 = vector.shape_cast %67 : vector<8xf32> to vector<8x1xf32>
    %69 = tpu.reciprocal %68 {approx = true} : vector<8x1xf32> -> vector<8x1xf32>
    %70 = vector.broadcast %69 : vector<8x1xf32> to vector<8x8xf32>
    %71 = arith.mulf %66, %70 : vector<8x8xf32>
    %72 = arith.truncf %71 : vector<8x8xf32> to vector<8x8xbf16>
    %cst_24 = arith.constant dense<0.000000e+00> : vector<8x8xf32>
    %73 = tpu.matmul %72, %56, %cst_24 {dimension_numbers = #tpu.dot_dimension_numbers<[1], [0], [0], [1], [0, 0, 1, 1], [], []>} : vector<8x8xbf16>, vector<8x8xbf16>, vector<8x8xf32> -> vector<8x8xf32>
    %74 = vector.extract_strided_slice %13 {offsets = [0, 24], sizes = [8, 8], strides = [1, 1]} : vector<8x96xbf16> to vector<8x8xbf16>
    %75 = vector.extract_strided_slice %13 {offsets = [0, 56], sizes = [8, 8], strides = [1, 1]} : vector<8x96xbf16> to vector<8x8xbf16>
    %76 = vector.extract_strided_slice %13 {offsets = [0, 88], sizes = [8, 8], strides = [1, 1]} : vector<8x96xbf16> to vector<8x8xbf16>
    %cst_25 = arith.constant dense<0.000000e+00> : vector<8x8xf32>
    %77 = tpu.matmul %74, %75, %cst_25 {dimension_numbers = #tpu.dot_dimension_numbers<[1], [1], [0], [0], [0, 0, 1, 0], [], []>} : vector<8x8xbf16>, vector<8x8xbf16>, vector<8x8xf32> -> vector<8x8xf32>
    %cst_26 = arith.constant 0.353553385 : f32
    %78 = vector.broadcast %cst_26 : f32 to vector<8x8xf32>
    %79 = arith.mulf %77, %78 : vector<8x8xf32>
    %80 = vector.broadcast %7 : vector<1x8xf32> to vector<8x8xf32>
    %81 = arith.addf %79, %80 : vector<8x8xf32>
    %cst_27 = arith.constant dense<0xFF800000> : vector<8xf32>
    %82 = vector.multi_reduction <maximumf>, %81, %cst_27 [1] : vector<8x8xf32> to vector<8xf32>
    %83 = vector.shape_cast %82 : vector<8xf32> to vector<8x1xf32>
    %84 = vector.broadcast %83 : vector<8x1xf32> to vector<8x8xf32>
    %85 = arith.subf %81, %84 : vector<8x8xf32>
    %86 = math.exp %85 : vector<8x8xf32>
    %cst_28 = arith.constant dense<0.000000e+00> : vector<8xf32>
    %87 = vector.multi_reduction <add>, %86, %cst_28 [1] : vector<8x8xf32> to vector<8xf32>
    %88 = vector.shape_cast %87 : vector<8xf32> to vector<8x1xf32>
    %89 = tpu.reciprocal %88 {approx = true} : vector<8x1xf32> -> vector<8x1xf32>
    %90 = vector.broadcast %89 : vector<8x1xf32> to vector<8x8xf32>
    %91 = arith.mulf %86, %90 : vector<8x8xf32>
    %92 = arith.truncf %91 : vector<8x8xf32> to vector<8x8xbf16>
    %cst_29 = arith.constant dense<0.000000e+00> : vector<8x8xf32>
    %93 = tpu.matmul %92, %76, %cst_29 {dimension_numbers = #tpu.dot_dimension_numbers<[1], [0], [0], [1], [0, 0, 1, 1], [], []>} : vector<8x8xbf16>, vector<8x8xbf16>, vector<8x8xf32> -> vector<8x8xf32>
    %94 = tpu.concatenate %33, %53, %73, %93 in 1 : vector<8x8xf32>, vector<8x8xf32>, vector<8x8xf32>, vector<8x8xf32> -> vector<8x32xf32>
    %95 = arith.truncf %94 : vector<8x32xf32> to vector<8x32xbf16>
    %c0_30 = arith.constant 0 : index
    %c0_31 = arith.constant 0 : index
    %96 = vector.load %arg6[%c0_30, %c0_31] : memref<32x32xbf16, #tpu.memory_space<vmem>>, vector<32x32xbf16>
    %cst_32 = arith.constant dense<0.000000e+00> : vector<8x32xf32>
    %97 = tpu.matmul %95, %96, %cst_32 {dimension_numbers = #tpu.dot_dimension_numbers<[1], [0], [0], [1], [0, 0, 1, 1], [], []>} : vector<8x32xbf16>, vector<32x32xbf16>, vector<8x32xf32> -> vector<8x32xf32>
    %c0_33 = arith.constant 0 : index
    %c0_34 = arith.constant 0 : index
    %98 = vector.load %arg7[%c0_33, %c0_34] : memref<1x32xf32, #tpu.memory_space<vmem>>, vector<1x32xf32>
    %99 = vector.broadcast %98 : vector<1x32xf32> to vector<8x32xf32>
    %100 = arith.addf %97, %99 : vector<8x32xf32>
    %101 = arith.addf %100, %5 : vector<8x32xf32>
    %cst_35 = arith.constant dense<0.000000e+00> : vector<8xf32>
    %102 = vector.multi_reduction <add>, %101, %cst_35 [1] : vector<8x32xf32> to vector<8xf32>
    %103 = vector.shape_cast %102 : vector<8xf32> to vector<8x1xf32>
    %cst_36 = arith.constant 3.200000e+01 : f32
    %104 = vector.broadcast %cst_36 : f32 to vector<8x1xf32>
    %105 = arith.divf %103, %104 : vector<8x1xf32>
    %106 = vector.broadcast %105 : vector<8x1xf32> to vector<8x32xf32>
    %107 = arith.subf %101, %106 : vector<8x32xf32>
    %108 = vector.broadcast %105 : vector<8x1xf32> to vector<8x32xf32>
    %109 = arith.subf %101, %108 : vector<8x32xf32>
    %110 = arith.mulf %107, %109 : vector<8x32xf32>
    %cst_37 = arith.constant dense<0.000000e+00> : vector<8xf32>
    %111 = vector.multi_reduction <add>, %110, %cst_37 [1] : vector<8x32xf32> to vector<8xf32>
    %112 = vector.shape_cast %111 : vector<8xf32> to vector<8x1xf32>
    %cst_38 = arith.constant 3.200000e+01 : f32
    %113 = vector.broadcast %cst_38 : f32 to vector<8x1xf32>
    %114 = arith.divf %112, %113 : vector<8x1xf32>
    %115 = vector.broadcast %105 : vector<8x1xf32> to vector<8x32xf32>
    %116 = arith.subf %101, %115 : vector<8x32xf32>
    %cst_39 = arith.constant 9.99999996E-13 : f32
    %117 = vector.broadcast %cst_39 : f32 to vector<8x1xf32>
    %118 = arith.addf %114, %117 : vector<8x1xf32>
    %119 = math.rsqrt %118 : vector<8x1xf32>
    %120 = vector.broadcast %119 : vector<8x1xf32> to vector<8x32xf32>
    %121 = arith.mulf %116, %120 : vector<8x32xf32>
    %c0_40 = arith.constant 0 : index
    %c0_41 = arith.constant 0 : index
    %122 = vector.load %arg8[%c0_40, %c0_41] : memref<1x32xf32, #tpu.memory_space<vmem>>, vector<1x32xf32>
    %123 = vector.broadcast %122 : vector<1x32xf32> to vector<8x32xf32>
    %124 = arith.mulf %121, %123 : vector<8x32xf32>
    %c0_42 = arith.constant 0 : index
    %c0_43 = arith.constant 0 : index
    %125 = vector.load %arg9[%c0_42, %c0_43] : memref<1x32xf32, #tpu.memory_space<vmem>>, vector<1x32xf32>
    %126 = vector.broadcast %125 : vector<1x32xf32> to vector<8x32xf32>
    %127 = arith.addf %124, %126 : vector<8x32xf32>
    %128 = arith.truncf %127 : vector<8x32xf32> to vector<8x32xbf16>
    %c0_44 = arith.constant 0 : index
    %c0_45 = arith.constant 0 : index
    %129 = vector.load %arg10[%c0_44, %c0_45] : memref<32x64xbf16, #tpu.memory_space<vmem>>, vector<32x64xbf16>
    %cst_46 = arith.constant dense<0.000000e+00> : vector<8x64xf32>
    %130 = tpu.matmul %128, %129, %cst_46 {dimension_numbers = #tpu.dot_dimension_numbers<[1], [0], [0], [1], [0, 0, 1, 1], [], []>} : vector<8x32xbf16>, vector<32x64xbf16>, vector<8x64xf32> -> vector<8x64xf32>
    %c0_47 = arith.constant 0 : index
    %c0_48 = arith.constant 0 : index
    %131 = vector.load %arg11[%c0_47, %c0_48] : memref<1x64xf32, #tpu.memory_space<vmem>>, vector<1x64xf32>
    %132 = vector.broadcast %131 : vector<1x64xf32> to vector<8x64xf32>
    %133 = arith.addf %130, %132 : vector<8x64xf32>
    %cst_49 = arith.constant 5.000000e-01 : f32
    %134 = vector.broadcast %cst_49 : f32 to vector<8x64xf32>
    %135 = arith.mulf %134, %133 : vector<8x64xf32>
    %cst_50 = arith.constant 4.471500e-02 : f32
    %136 = vector.broadcast %cst_50 : f32 to vector<8x64xf32>
    %137 = arith.mulf %136, %133 : vector<8x64xf32>
    %138 = arith.mulf %137, %133 : vector<8x64xf32>
    %139 = arith.mulf %138, %133 : vector<8x64xf32>
    %140 = arith.addf %133, %139 : vector<8x64xf32>
    %cst_51 = arith.constant 0.797884583 : f32
    %141 = vector.broadcast %cst_51 : f32 to vector<8x64xf32>
    %142 = arith.mulf %141, %140 : vector<8x64xf32>
    %143 = math.tanh %142 : vector<8x64xf32>
    %cst_52 = arith.constant 1.000000e+00 : f32
    %144 = vector.broadcast %cst_52 : f32 to vector<8x64xf32>
    %145 = arith.addf %144, %143 : vector<8x64xf32>
    %146 = arith.mulf %135, %145 : vector<8x64xf32>
    %147 = arith.truncf %146 : vector<8x64xf32> to vector<8x64xbf16>
    %c0_53 = arith.constant 0 : index
    %c0_54 = arith.constant 0 : index
    %148 = vector.load %arg12[%c0_53, %c0_54] : memref<64x32xbf16, #tpu.memory_space<vmem>>, vector<64x32xbf16>
    %cst_55 = arith.constant dense<0.000000e+00> : vector<8x32xf32>
    %149 = tpu.matmul %147, %148, %cst_55 {dimension_numbers = #tpu.dot_dimension_numbers<[1], [0], [0], [1], [0, 0, 1, 1], [], []>} : vector<8x64xbf16>, vector<64x32xbf16>, vector<8x32xf32> -> vector<8x32xf32>
    %c0_56 = arith.constant 0 : index
    %c0_57 = arith.constant 0 : index
    %150 = vector.load %arg13[%c0_56, %c0_57] : memref<1x32xf32, #tpu.memory_space<vmem>>, vector<1x32xf32>
    %151 = vector.broadcast %150 : vector<1x32xf32> to vector<8x32xf32>
    %152 = arith.addf %149, %151 : vector<8x32xf32>
    %153 = arith.addf %152, %127 : vector<8x32xf32>
    %cst_58 = arith.constant dense<0.000000e+00> : vector<8xf32>
    %154 = vector.multi_reduction <add>, %153, %cst_58 [1] : vector<8x32xf32> to vector<8xf32>
    %155 = vector.shape_cast %154 : vector<8xf32> to vector<8x1xf32>
    %cst_59 = arith.constant 3.200000e+01 : f32
    %156 = vector.broadcast %cst_59 : f32 to vector<8x1xf32>
    %157 = arith.divf %155, %156 : vector<8x1xf32>
    %158 = vector.broadcast %157 : vector<8x1xf32> to vector<8x32xf32>
    %159 = arith.subf %153, %158 : vector<8x32xf32>
    %160 = vector.broadcast %157 : vector<8x1xf32> to vector<8x32xf32>
    %161 = arith.subf %153, %160 : vector<8x32xf32>
    %162 = arith.mulf %159, %161 : vector<8x32xf32>
    %cst_60 = arith.constant dense<0.000000e+00> : vector<8xf32>
    %163 = vector.multi_reduction <add>, %162, %cst_60 [1] : vector<8x32xf32> to vector<8xf32>
    %164 = vector.shape_cast %163 : vector<8xf32> to vector<8x1xf32>
    %cst_61 = arith.constant 3.200000e+01 : f32
    %165 = vector.broadcast %cst_61 : f32 to vector<8x1xf32>
    %166 = arith.divf %164, %165 : vector<8x1xf32>
    %167 = vector.broadcast %157 : vector<8x1xf32> to vector<8x32xf32>
    %168 = arith.subf %153, %167 : vector<8x32xf32>
    %cst_62 = arith.constant 9.99999996E-13 : f32
    %169 = vector.broadcast %cst_62 : f32 to vector<8x1xf32>
    %170 = arith.addf %166, %169 : vector<8x1xf32>
    %171 = math.rsqrt %170 : vector<8x1xf32>
    %172 = vector.broadcast %171 : vector<8x1xf32> to vector<8x32xf32>
    %173 = arith.mulf %168, %172 : vector<8x32xf32>
    %c0_63 = arith.constant 0 : index
    %c0_64 = arith.constant 0 : index
    %174 = vector.load %arg14[%c0_63, %c0_64] : memref<1x32xf32, #tpu.memory_space<vmem>>, vector<1x32xf32>
    %175 = vector.broadcast %174 : vector<1x32xf32> to vector<8x32xf32>
    %176 = arith.mulf %173, %175 : vector<8x32xf32>
    %c0_65 = arith.constant 0 : index
    %c0_66 = arith.constant 0 : index
    %177 = vector.load %arg15[%c0_65, %c0_66] : memref<1x32xf32, #tpu.memory_space<vmem>>, vector<1x32xf32>
    %178 = vector.broadcast %177 : vector<1x32xf32> to vector<8x32xf32>
    %179 = arith.addf %176, %178 : vector<8x32xf32>
    %180 = arith.truncf %179 : vector<8x32xf32> to vector<8x32xbf16>
    %c0_67 = arith.constant 0 : index
    %c0_68 = arith.constant 0 : index
    %c0_69 = arith.constant 0 : index
    %181 = vector.load %arg16[%c0_67, %c0_68, %c0_69] : memref<1x8x32xbf16, #tpu.memory_space<vmem>>, vector<1x8x32xbf16>
    %182 = vector.shape_cast %181 : vector<1x8x32xbf16> to vector<8x32xbf16>
    %183 = vector.shape_cast %180 : vector<8x32xbf16> to vector<1x8x32xbf16>
    tpu.vector_store %arg16[%c0_67, %c0_68, %c0_69], %183 {strides = array<i32>} : memref<1x8x32xbf16, #tpu.memory_space<vmem>>, vector<1x8x32xbf16>,
    return
  }
  func.func @transform_0(%arg0: i32, %arg1: i32) -> (i32, i32, i32) {
    %c0_i32 = arith.constant 0 : i32
    %c0_i32_0 = arith.constant 0 : i32
    %c0_i32_1 = arith.constant 0 : i32
    return %arg0, %c0_i32, %c0_i32_0 : i32, i32, i32
  }
  func.func @transform_1(%arg0: i32, %arg1: i32) -> (i32, i32, i32) {
    %c0_i32 = arith.constant 0 : i32
    %c0_i32_0 = arith.constant 0 : i32
    %c0_i32_1 = arith.constant 0 : i32
    return %arg0, %c0_i32, %c0_i32_0 : i32, i32, i32
  }
  func.func @transform_2(%arg0: i32, %arg1: i32) -> (i32, i32) {
    %c0_i32 = arith.constant 0 : i32
    %c0_i32_0 = arith.constant 0 : i32
    %c0_i32_1 = arith.constant 0 : i32
    return %c0_i32, %c0_i32_0 : i32, i32
  }
  func.func @transform_3(%arg0: i32, %arg1: i32) -> (i32, i32) {
    %c0_i32 = arith.constant 0 : i32
    %c0_i32_0 = arith.constant 0 : i32
    %c0_i32_1 = arith.constant 0 : i32
    return %c0_i32, %c0_i32_0 : i32, i32
  }
  func.func @transform_4(%arg0: i32, %arg1: i32) -> (i32, i32) {
    %c0_i32 = arith.constant 0 : i32
    %c0_i32_0 = arith.constant 0 : i32
    %c0_i32_1 = arith.constant 0 : i32
    return %c0_i32, %c0_i32_0 : i32, i32
  }
  func.func @transform_5(%arg0: i32, %arg1: i32) -> (i32, i32) {
    %c0_i32 = arith.constant 0 : i32
    %c0_i32_0 = arith.constant 0 : i32
    %c0_i32_1 = arith.constant 0 : i32
    return %c0_i32, %c0_i32_0 : i32, i32
  }
  func.func @transform_6(%arg0: i32, %arg1: i32) -> (i32, i32) {
    %c0_i32 = arith.constant 0 : i32
    %c0_i32_0 = arith.constant 0 : i32
    %c0_i32_1 = arith.constant 0 : i32
    return %c0_i32, %c0_i32_0 : i32, i32
  }
  func.func @transform_7(%arg0: i32, %arg1: i32) -> (i32, i32) {
    %c0_i32 = arith.constant 0 : i32
    %c0_i32_0 = arith.constant 0 : i32
    %c0_i32_1 = arith.constant 0 : i32
    return %c0_i32, %c0_i32_0 : i32, i32
  }
  func.func @transform_8(%arg0: i32, %arg1: i32) -> (i32, i32) {
    %c0_i32 = arith.constant 0 : i32
    %c0_i32_0 = arith.constant 0 : i32
    %c0_i32_1 = arith.constant 0 : i32
    return %c0_i32, %c0_i32_0 : i32, i32
  }
  func.func @transform_9(%arg0: i32, %arg1: i32) -> (i32, i32) {
    %c0_i32 = arith.constant 0 : i32
    %c0_i32_0 = arith.constant 0 : i32
    %c0_i32_1 = arith.constant 0 : i32
    return %c0_i32, %c0_i32_0 : i32, i32
  }
  func.func @transform_10(%arg0: i32, %arg1: i32) -> (i32, i32) {
    %c0_i32 = arith.constant 0 : i32
    %c0_i32_0 = arith.constant 0 : i32
    %c0_i32_1 = arith.constant 0 : i32
    return %c0_i32, %c0_i32_0 : i32, i32
  }
  func.func @transform_11(%arg0: i32, %arg1: i32) -> (i32, i32) {
    %c0_i32 = arith.constant 0 : i32
    %c0_i32_0 = arith.constant 0 : i32
    %c0_i32_1 = arith.constant 0 : i32
    return %c0_i32, %c0_i32_0 : i32, i32
  }
  func.func @transform_12(%arg0: i32, %arg1: i32) -> (i32, i32) {
    %c0_i32 = arith.constant 0 : i32
    %c0_i32_0 = arith.constant 0 : i32
    %c0_i32_1 = arith.constant 0 : i32
    return %c0_i32, %c0_i32_0 : i32, i32
  }
  func.func @transform_13(%arg0: i32, %arg1: i32) -> (i32, i32) {
    %c0_i32 = arith.constant 0 : i32
    %c0_i32_0 = arith.constant 0 : i32
    %c0_i32_1 = arith.constant 0 : i32
    return %c0_i32, %c0_i32_0 : i32, i32
  }
  func.func @transform_14(%arg0: i32, %arg1: i32) -> (i32, i32, i32) {
    %c0_i32 = arith.constant 0 : i32
    %c0_i32_0 = arith.constant 0 : i32
    %c0_i32_1 = arith.constant 0 : i32
    return %arg0, %c0_i32, %c0_i32_0 : i32, i32, i32
  }
}

</mosaic_0001>

<bundles_post_ra>
// kernel: albert_forward.5
= control target key start
LH: loop header
LB: loop body
LE: loop exit
PB: predicated region body
PF: predicated region fallthrough
CT: control target
= control target key end

     0   :  { %14 = vsyncpa [#allocation3], 0  ;;  %v376_v1 = vmov 0.0   ;;  %vm377_vm0 = vmmov 0   ;;  %s494_s0 = inlined_call_operand.vmem [shape: bf16[2,32], index: 0, kind: input, shape index: {}]   ;;  %s495_s1 = inlined_call_operand.vmem [shape: bf16[32,32], index: 1, kind: input, shape index: {}]   ;;  %s496_s2 = inlined_call_operand.vmem [shape: f32[1,32], index: 2, kind: input, shape index: {}]   ;;  %s497_s3 = inlined_call_operand.vmem [shape: bf16[32,2], index: 3, kind: input, shape index: {}]   ;;  %s498_s4 = inlined_call_operand.vmem [shape: f32[1,2], index: 4, kind: input, shape index: {}]   ;;  %s499_s5 = inlined_call_operand.vmem [shape: s32[2,1], index: 5, kind: input, shape index: {}]   ;;  %s500_s6 = inlined_call_operand.hbm [shape: f32[2,2], index: 6, kind: output, shape index: {0}]   ;;  %s501_s7 = inlined_call_operand.hbm [shape: f32[2,2], index: 7, kind: output, shape index: {1}]   ;;  %s502_s8 = inlined_call_operand.hbm [shape: f32[1,1], index: 8, kind: output, shape index: {2}]  }
   0x1   :  { %v294_v0 = vld [vmem:[%s495_s1] sm:$0xff]   ;;  %268 = vmatprep.subr.bf16.mxu0 %v376_v1  ;;  %276 = vmatprep.subr.bf16.mxu1 %v376_v1  ;;  %v295_v2 = vld [vmem:[%s495_s1 + $0x8] sm:$0xff]  }
   0x2   :  { %269 = vmatpush3.bf16.msra.mxu0 %v294_v0  ;;  %272 = vmatprep.mubr.msk.bf16.mxu0 %vm377_vm0, %v376_v1 }
   0x3   :  { %270 = vmatprep.subr.bf16.mxu0 %v376_v1  ;;  %280 = vmatprep.mubr.msk.bf16.mxu1 %vm377_vm0, %v376_v1 }
   0x4   :  { %15 = vsyncpa [#allocation5], 0  ;;  %v29_v3 = vld [vmem:[%s494_s0] sm:$0x1]  ;;  %vm53_vm1 = vcmask 261120   ;;  %v297_v5 = vld [vmem:[%s497_s3 + $0x8] sm:$0xff]   ;;  %v180_v29 = vlaneseq }
   0x5   :  { %v296_v4 = vld [vmem:[%s497_s3] sm:$0xff]   ;;  %vm165_vm2 = vcmask 9216   ;;  %v378_v22 = vmov 0   ;;  %vm196_vm4 = vcmask 1024   ;;  %s380_s17 = smov [#allocation2]  }
   0x6   :  { %271 = vmatpush3.bf16.msra.mxu0 %v295_v2  ;;  %277 = vmatpush3.bf16.msra.mxu1 %v296_v4  ;;  %v253_v6 = vld [vmem:[%s496_s2] ss:$0 sm:$0xff]  ;;  %v181_v30 = vand.u32 127, %v180_v29  ;;  %s218_s18 = sshll.u32 %s380_s17, 4  ;;  %s219_s18 = int_to_ptr.vmem [resolvable:$true] %s218_s18 }
   0x7   :  { %278 = vmatprep.subr.bf16.mxu1 %v376_v1  ;;  %v257_v14 = vld [vmem:[%s498_s4] ss:$0 sm:$0xff]  ;;  %292 = vset.pattern.permute.xlu1 %v378_v22  ;;  %s379_s4 = smov [#allocation4]  }
   0x8   :  { %v179_v21 = vld [vmem:[%s499_s5] sm:$0x3]  ;;  %293 = vset.pattern.permute.xlu0 %v378_v22  ;;  %s228_s5 = sshll.u32 %s379_s4, 4  ;;  %s229_s5 = int_to_ptr.vmem [resolvable:$true] %s228_s5 }
   0x9   :  { %273 = vmatmul.mubr.msk.bf16.vlgmr.msra.gmra.mrb[0].mxu0 %vm53_vm1, %v29_v3  ;;  %183 = vperm.xlu1 %292, %v179_v21   ;;  %s306_s19 = scalar_lea.vmem %s229_s5, 32  ;;  %p311_p1 = scmp.lt.s32.totalorder %s229_s5, %s229_s5 }
   0xa   :  { %279 = vmatpush3.bf16.msra.mxu1 %v297_v5  ;;  %p307_p0 = scmp.ne.s32.totalorder %s229_s5, %s306_s19  ;;  %p312_p2 = scmp.lt.s32.totalorder %s306_s19, %s306_s19 }
   0xc   :  { %p313_p3 = por %p312_p2, %p311_p1 }
   0xe   :  { %p314_p4 = pnand %p313_p3, %p307_p0 }
  0x88   :  { %v184_v31 = vpop.permute.xlu1 %183 }
  0x89   :  { %vm185_vm3 = vcmp.eq.s32.totalorder %v181_v30, %v184_v31 }
  0x8a   :  { %v261_v36 = vsel %vm185_vm3, 1.0, %v376_v1 }
  0xdc   :  { %v91_v7 = vpop.f32.mrb[0].mxu0 }
  0xdd   :  { %v92_v8 = vadd.f32 %v253_v6, %v91_v7  ;;  %v274_v9 = vpop.f32.mrb[1].mxu0 }
  0xde   :  { %v94_v10 = vpop.f32.mrb[2].mxu0 }
  0xdf   :  { %298 = vtanh.f32 %v92_v8  ;;  %v275_v11 = vpop.f32.mrb[3].mxu0 }
  0xe9   :  { %v299_v12 = vpop.eup %298 }
  0xea   :  { %v98_v13 = vpack.c.bf16 %v299_v12, %v299_v12 }
  0xec   :  { %281 = vmatmul.mubr.msk.bf16.vlgmr.msra.gmra.mrb[0].mxu1 %vm53_vm1, %v98_v13 }
 0x1bf   :  { %v159_v15 = vpop.f32.mrb[0].mxu1 }
 0x1c0   :  { %v160_v16 = vadd.f32 %v257_v14, %v159_v15  ;;  %v282_v17 = vpop.f32.mrb[1].mxu1 }
 0x1c1   :  { %v162_v18 = vpop.f32.mrb[2].mxu1 }
 0x1c2   :  { %v283_v19 = vpop.f32.mrb[3].mxu1  ;;  %v166_v20 = vsel %vm165_vm2, %v160_v16, -inf  ;;  %175 = vst.msk [vmem:[#allocation2] sm:$0x3] %vm165_vm2, %v160_v16 }
 0x1c3   :  { %167 = vmax.xlane.f32.xlu0 %v166_v20 }
 0x250   :  { %v168_v23 = vpop.xlane.xlu0 %167 }
 0x251   :  { %v169_v24 = vsub.f32 %v160_v16, %v168_v23 }
 0x253   :  { %v170_v25 = vmul.f32 1.442695, %v169_v24 }
 0x255   :  { %300 = vpow2.f32 %v170_v25 }
 0x25f   :  { %v301_v26 = vpop.eup %300 }
 0x260   :  { %v172_v27 = vsel %vm165_vm2, %v301_v26, 0.0 }
 0x261   :  { %173 = vadd.xlane.f32.xlu0 %v172_v27 }
 0x2ee   :  { %v174_v28 = vpop.xlane.xlu0 %173 }
 0x2ef   :  { %302 = vrcp.f32 %v174_v28 }
 0x2f0   :  { %304 = vlog2.f32 %v174_v28 }
 0x2f9   :  { %v303_v32 = vpop.eup %302 }
 0x2fa   :  { %v305_v33 = vpop.eup %304  ;;  %v177_v34 = vmul.f32 %v303_v32, %v301_v26 }
 0x2fb   :  { %v189_v35 = vmul.f32 0.6931472, %v305_v33 }
 0x2fc   :  { %178 = vst.msk [vmem:[#allocation4] sm:$0x3] %vm165_vm2, %v177_v34 }
 0x2fd   :  { %v190_v37 = vsub.f32 %v169_v24, %v189_v35 }
 0x2ff   :  { %v191_v38 = vmul.f32 %v261_v36, %v190_v37 }
 0x301   :  { %v192_v39 = vsel %vm165_vm2, %v191_v38, 0.0 }
 0x302   :  { %193 = vadd.xlane.f32.xlu1 %v192_v39 }
 0x38f   :  { %v194_v40 = vpop.xlane.xlu1 %193 }
 0x390   :  { %v195_v41 = vsub.f32 0.0, %v194_v40 }
 0x392   :  { %v197_v42 = vsel %vm196_vm4, %v195_v41, 0.0 }
 0x393   :  { %198 = vadd.xlane.f32.xlu0 %v197_v42 }
 0x394   :  { %317 = shalt.err (!%p314_p4)
}
 0x395   :  { %s318_s22 = scalar_lea.hbm %s501_s7, 32 }
 0x396   :  { %p319_p5 = scmp.ne.s32.totalorder %s501_s7, %s318_s22  ;;  %p322_p6 = scmp.lt.u32.totalorder %s318_s22, %s501_s7 }
 0x398   :  { %p324_p7 = pnand %p322_p6, %p319_p5 }
 0x39a   :  { %327 = shalt.err (!%p324_p7)
}
 0x39b   :  { %231 = dma.vmem_to_hbm [thread:$0]  %s229_s5, 32, %s501_s7, [#allocation5]  }
 0x39c   :  { %s328_s29 = scalar_lea.vmem %s219_s18, 32  ;;  %p333_p9 = scmp.lt.s32.totalorder %s219_s18, %s219_s18 }
 0x39d   :  { %p329_p8 = scmp.ne.s32.totalorder %s219_s18, %s328_s29  ;;  %p334_p10 = scmp.lt.s32.totalorder %s328_s29, %s328_s29 }
 0x39f   :  { %p335_p11 = por %p334_p10, %p333_p9 }
 0x3a1   :  { %p336_p12 = pnand %p335_p11, %p329_p8 }
 0x3a3   :  { %339 = shalt.err (!%p336_p12)
}
 0x3a4   :  { %s340_s10 = scalar_lea.hbm %s500_s6, 32 }
 0x3a5   :  { %p341_p13 = scmp.ne.s32.totalorder %s500_s6, %s340_s10  ;;  %p344_p0 = scmp.lt.u32.totalorder %s340_s10, %s500_s6 }
 0x3a7   :  { %p346_p1 = pnand %p344_p0, %p341_p13 }
 0x3a9   :  { %349 = shalt.err (!%p346_p1)
}
 0x3aa   :  { %221 = dma.vmem_to_hbm [thread:$0]  %s219_s18, 32, %s500_s6, [#allocation3]   ;;  %vm210_vm5 = vcmask 0  }
 0x3ab   :  { %s381_s15 = smov [#allocation6]  }
 0x3ac   :  { %s238_s0 = sshll.u32 %s381_s15, 4  ;;  %s239_s0 = int_to_ptr.vmem [resolvable:$true] %s238_s0 }
 0x3ad   :  { %s350_s2 = scalar_lea.vmem %s239_s0, 16  ;;  %s354_s3 = scalar_lea.vmem %s239_s0, 32 }
 0x3ae   :  { %p351_p2 = scmp.ne.s32.totalorder %s239_s0, %s350_s2  ;;  %p355_p3 = scmp.lt.s32.totalorder %s239_s0, %s239_s0 }
 0x3af   :  { %p356_p4 = scmp.lt.s32.totalorder %s354_s3, %s350_s2 }
 0x3b1   :  { %p357_p5 = por %p356_p4, %p355_p3 }
 0x3b3   :  { %p358_p6 = pnand %p357_p5, %p351_p2 }
 0x420   :  { %v199_v43 = vpop.xlane.xlu0 %198 }
 0x421   :  { %v200_v44 = vrot.slane %v199_v43, 4 }
 0x423   :  { %v201_v45 = vadd.f32 %v200_v44, %v199_v43 }
 0x425   :  { %v202_v46 = vrot.slane %v201_v45, 2 }
 0x427   :  { %v203_v47 = vadd.f32 %v202_v46, %v201_v45 }
 0x429   :  { %v204_v48 = vrot.slane %v203_v47, 1 }
 0x42b   :  { %v205_v49 = vadd.f32 %v204_v48, %v203_v47 }
 0x42d   :  { %284 = vpush %v205_v49 }
 0x45e   :  { %s285_s16 = spop %284 }
 0x45f   :  { %v207_v50 = vstv %s285_s16 }
 0x460   :  { %v209_v51 = vmul.f32 0.5, %v207_v50 }
 0x462   :  { %211 = vst.msk [vmem:[#allocation6] sm:$0x1] %vm210_vm5, %v209_v51 }
 0x463   :  { %361 = shalt.err (!%p358_p6)
}
 0x464   :  { %s362_s5 = scalar_lea.hbm %s502_s8, 16 }
 0x465   :  { %p363_p7 = scmp.ne.s32.totalorder %s502_s8, %s362_s5  ;;  %p366_p8 = scmp.lt.u32.totalorder %s362_s5, %s502_s8 }
 0x467   :  { %p368_p9 = pnand %p366_p8, %p363_p7 }
 0x469   :  { %371 = shalt.err (!%p368_p9)
}
 0x46a   :  { %241 = dma.vmem_to_hbm [thread:$0]  %s239_s0, 16, %s502_s8, [#allocation5]  }
 0x46b   :  { %372 = dma.done.wait [#allocation3], 32  }
 0x46c   :  { %373 = vsyncadd [#allocation3], 4294967264 }
 0x46d   :  { %374 = dma.done.wait [#allocation5], 48  }
 0x46e   :  { %375 = vsyncadd [#allocation5], 4294967248 }
 0x46f   :  { %251 = vsyncpa [#allocation3], 1 }
 0x470   :  { %252 = vsyncpa [#allocation5], 1 }

// kernel: albert_forward.3
= control target key start
LH: loop header
LB: loop body
LE: loop exit
PB: predicated region body
PF: predicated region fallthrough
CT: control target
= control target key end

     0   :  { %vm25_vm0 = vcmask 130048   ;;  %v174_v15 = vmov 0.0   ;;  %vm175_vm1 = vmmov 0   ;;  %vm139_vm2 = vcmask 257024   ;;  %s232_s0 = inlined_call_operand.vmem [shape: bf16[16,16], index: 0, kind: input, shape index: {}]   ;;  %s233_s3 = inlined_call_operand.vmem [shape: bf16[16,32], index: 3, kind: input, shape index: {}]   ;;  %s234_s1 = inlined_call_operand.vmem [shape: f32[1,16], index: 1, kind: input, shape index: {}]   ;;  %s235_s2 = inlined_call_operand.vmem [shape: f32[1,16], index: 2, kind: input, shape index: {}]   ;;  %s236_s4 = inlined_call_operand.vmem [shape: f32[1,32], index: 4, kind: input, shape index: {}]   ;;  %s237_s5 = inlined_call_operand.vmem [shape: bf16[16,32], index: 5, kind: output, shape index: {}]  }
   0x1   :  { %v156_v0 = vld [vmem:[%s232_s0] sm:$0xff]   ;;  %161 = vmatprep.subr.bf16.mxu0 %v174_v15  ;;  %163 = vmatprep.mubr.msk.bf16.mxu0 %vm175_vm1, %v174_v15 }
   0x2   :  { %v157_v1 = vunpack.c.l.bf16 %v156_v0  ;;  %v158_v2 = vunpack.c.h.bf16 %v156_v0  ;;  %v169_v16 = vld [vmem:[%s233_s3] sm:$0xff]  }
   0x3   :  { %162 = vmatpush3.bf16.msra.mxu0 %v169_v16  ;;  %v146_v25 = vld [vmem:[%s234_s1] ss:$0 sm:$0xff] }
   0x4   :  { %v26_v3 = vsel %vm25_vm0, %v157_v1, 0.0  ;;  %v29_v4 = vsel %vm25_vm0, %v158_v2, 0.0  ;;  %v147_v29 = vld [vmem:[%s235_s2] ss:$0 sm:$0xff] }
   0x5   :  { %27 = vadd.xlane.f32.xlu0 %v26_v3  ;;  %v148_v34 = vld [vmem:[%s236_s4] ss:$0 sm:$0xff] }
   0x9   :  { %30 = vadd.xlane.f32.xlu0 %v29_v4 }
  0x92   :  { %v28_v5 = vpop.xlane.xlu0 %27 }
  0x93   :  { %v33_v6 = vmul.f32 0.0625, %v28_v5 }
  0x95   :  { %v35_v7 = vsub.f32 %v157_v1, %v33_v6 }
  0x96   :  { %v31_v8 = vpop.xlane.xlu0 %30 }
  0x97   :  { %v34_v9 = vmul.f32 0.0625, %v31_v8  ;;  %v37_v10 = vmul.f32 %v35_v7, %v35_v7 }
  0x99   :  { %v36_v11 = vsub.f32 %v158_v2, %v34_v9  ;;  %v39_v12 = vsel %vm25_vm0, %v37_v10, 0.0 }
  0x9a   :  { %40 = vadd.xlane.f32.xlu1 %v39_v12 }
  0x9b   :  { %v38_v13 = vmul.f32 %v36_v11, %v36_v11 }
  0x9d   :  { %v42_v14 = vsel %vm25_vm0, %v38_v13, 0.0 }
  0x9e   :  { %43 = vadd.xlane.f32.xlu1 %v42_v14 }
 0x127   :  { %v41_v17 = vpop.xlane.xlu1 %40 }
 0x128   :  { %v45_v18 = vmul.f32 0.0625, %v41_v17 }
 0x12a   :  { %v47_v19 = vadd.f32 1e-12, %v45_v18 }
 0x12b   :  { %v44_v20 = vpop.xlane.xlu1 %43 }
 0x12c   :  { %170 = vrsqrt.f32 %v47_v19  ;;  %v46_v21 = vmul.f32 0.0625, %v44_v20 }
 0x12e   :  { %v48_v22 = vadd.f32 1e-12, %v46_v21 }
 0x130   :  { %172 = vrsqrt.f32 %v48_v22 }
 0x136   :  { %v171_v23 = vpop.eup %170 }
 0x137   :  { %v51_v24 = vmul.f32 %v171_v23, %v35_v7 }
 0x139   :  { %v60_v28 = vmul.f32 %v146_v25, %v51_v24 }
 0x13a   :  { %v173_v26 = vpop.eup %172 }
 0x13b   :  { %v52_v27 = vmul.f32 %v173_v26, %v36_v11  ;;  %v69_v31 = vadd.f32 %v147_v29, %v60_v28 }
 0x13d   :  { %v61_v30 = vmul.f32 %v146_v25, %v52_v27 }
 0x13f   :  { %v70_v32 = vadd.f32 %v147_v29, %v61_v30 }
 0x141   :  { %v71_v33 = vpack.c.bf16 %v70_v32, %v69_v31 }
 0x143   :  { %164 = vmatmul.mubr.msk.bf16.vlgmr.msra.gmra.mrb[0].mxu0 %vm25_vm0, %v71_v33 }
 0x216   :  { %v124_v35 = vpop.f32.mrb[0].mxu0 }
 0x217   :  { %v125_v36 = vadd.f32 %v148_v34, %v124_v35  ;;  %v165_v37 = vpop.f32.mrb[1].mxu0 }
 0x218   :  { %v127_v38 = vpop.f32.mrb[2].mxu0 }
 0x219   :  { %v153_v39 = vpack.c.bf16 %v125_v36, %v125_v36  ;;  %v128_v40 = vadd.f32 %v148_v34, %v127_v38  ;;  %v166_v41 = vpop.f32.mrb[3].mxu0 }
 0x21b   :  { %140 = vst.msk [vmem:[%s237_s5] sm:$0xf] %vm139_vm2, %v153_v39  ;;  %v154_v42 = vpack.c.bf16 %v128_v40, %v128_v40 }
 0x21d   :  { %141 = vst.msk [vmem:[%s237_s5 + $0x4] sm:$0xf] %vm139_vm2, %v154_v42 }

// kernel: albert_forward.4
= control target key start
LH: loop header
LB: loop body
LE: loop exit
PB: predicated region body
PF: predicated region fallthrough
CT: control target
= control target key end

     0   :  { %s1778_s29 = smov 0   ;;  %s1780_s30 = smov 0   ;;  %s1992_s0 = inlined_call_operand.vmem [shape: bf16[2,8,32], index: 0, kind: input, shape index: {}]   ;;  %s1993_s1 = inlined_call_operand.vmem [shape: f32[2,1,8], index: 1, kind: input, shape index: {}]   ;;  %s1994_s2 = inlined_call_operand.vmem [shape: bf16[32,96], index: 2, kind: input, shape index: {}]   ;;  %s1995_s3 = inlined_call_operand.vmem [shape: f32[1,96], index: 3, kind: input, shape index: {}]   ;;  %s1996_s4 = inlined_call_operand.vmem [shape: bf16[32,32], index: 4, kind: input, shape index: {}]   ;;  %s1997_s5 = inlined_call_operand.vmem [shape: f32[1,32], index: 5, kind: input, shape index: {}]   ;;  %s1998_s6 = inlined_call_operand.vmem [shape: f32[1,32], index: 6, kind: input, shape index: {}]   ;;  %s1999_s7 = inlined_call_operand.vmem [shape: f32[1,32], index: 7, kind: input, shape index: {}]   ;;  %s2000_s8 = inlined_call_operand.vmem [shape: bf16[32,64], index: 8, kind: input, shape index: {}]   ;;  %s2001_s9 = inlined_call_operand.vmem [shape: f32[1,64], index: 9, kind: input, shape index: {}]   ;;  %s2002_s10 = inlined_call_operand.vmem [shape: bf16[64,32], index: 10, kind: input, shape index: {}]   ;;  %s2003_s11 = inlined_call_operand.vmem [shape: f32[1,32], index: 11, kind: input, shape index: {}]   ;;  %s2004_s12 = inlined_call_operand.vmem [shape: f32[1,32], index: 12, kind: input, shape index: {}]   ;;  %s2005_s13 = inlined_call_operand.vmem [shape: f32[1,32], index: 13, kind: input, shape index: {}]   ;;  %s2006_s14 = inlined_call_operand.vmem [shape: bf16[2,8,32], index: 14, kind: output, shape index: {}]  }
   0x1   :  { %s1782_s15 = smov 0   ;;  %s1784_s16 = smov 0  }
   0x2   :  { %s1786_s17 = smov 0  }
   0x3 LB: > { %2008 = sst [smem:[#allocation2_spill]] %s1681_s16  ;;  %s33_s18 = sadd.s32 1, %s1677_s15  ;;  %s1685_s17 = sphi %s1786_s17, %s24_s17   ;;  %s1681_s16 = sphi %s1784_s16, %s2013_s16   ;;  %s1677_s15 = sphi %s1782_s15, %s2015_s15   ;;  %s1673_s30 = sphi %s1780_s30, %s2011_s30   ;;  %s1669_s29 = sphi %s1778_s29, %s2014_s29  }
   0x4   : > { %s36_s19 = sadd.s32 1, %s1681_s16  ;;  %p34_p0 = scmp.ge.s32.totalorder %s33_s18, 2 }
   0x5   : > { %p1408_p1 = scmp.ge.s32.totalorder %s1685_s17, 1  ;;  %p431_p2 = scmp.lt.s32.totalorder %s1685_s17, 5 }
   0x6   : > { %s2017_s18 = smov (%p34_p0, %s33_s18), 0  ;;  %s2019_s19 = smov (!%p34_p0, %s36_s19), %s1681_s16 }
   0x7   : > { %2009 = sst [smem:[#allocation3_spill]] %s2017_s18  ;;  %p432_p3 = pnand %p1408_p1, %p431_p2 }
   0x8   : > { %p38_p4 = scmp.ge.s32.totalorder %s2019_s19, 2  ;;  %p478_p5 = scmp.lt.s32.totalorder (!%p432_p3), %s1673_s30, 1 }
   0x9   : > { %435 = sbr.rel (%p432_p3) target bundleno = 2599 (0xa27), region = 76  ;;  %p1411_p6 = scmp.ne.s32.totalorder (!%p432_p3), %s1669_s29, 0 }
   0xa   : > { %s2021_s19 = smov (%p38_p4, %s2019_s19), 0 }
   0xb   : > { %2010 = sst [smem:[#allocation4_spill]] %s2021_s19 }
  0x10   : > { %s2023_s30 = smov (!%p478_p5, %s1673_s30), 1  ;;  %493 = sbr.rel (%p1411_p6) target bundleno = 23 (0x17), region = 80 }
  0x11   : > { %s1409_s20 = sshll.u32 %s2023_s30, 2  ;;  %s484_s23 = scalar_lea.vmem %s1993_s1, %s2023_s30  ;;  %vm495_vm0 = vcmask (!%p1411_p6), 257024  }
  0x12   : > { %s481_s26 = scalar_lea.vmem %s1992_s0, %s1409_s20  ;;  %s1821_s18 = scalar_lea.vmem %s2006_s14, %s1409_s20 }
  0x13   : > { %v494_v0 = vld [vmem:[%s481_s26] sm:$0xf] (!%p1411_p6) }
  0x14   : > { %496 = vst.msk [vmem:[%s1821_s18] sm:$0xf] (!%p1411_p6), %vm495_vm0, %v494_v0 }
  0x17 PF: > { %v1615_v1 = vld [vmem:[%s1994_s2] sm:$0xff]   ;;  %v1687_v2 = vmov 0.0   ;;  %v1616_v3 = vld [vmem:[%s1994_s2 + $0x8] sm:$0xff]   ;;  %vm1688_vm1 = vmmov 0   ;;  %vm523_vm2 = vcmask 261120   ;;  %s1689_s19 = smov 120  }
  0x18   : > { %1475 = vmatprep.subr.bf16.mxu0 %v1687_v2  ;;  %1483 = vmatprep.subr.bf16.mxu1 %v1687_v2  ;;  %v1412_v5 = vld [vmem:[%s1995_s3] ss:$0 sm:$0xff]  ;;  %s1690_s22 = smov 96   ;;  %s1691_s24 = smov 80   ;;  %vm571_vm3 = vcmask 64512   ;;  %vm643_vm4 = vcmask 1043456  }
  0x19   : > { %1476 = vmatpush3.bf16.msra.mxu0 %v1615_v1  ;;  %1479 = vmatprep.mubr.msk.bf16.mxu0 %vm1688_vm1, %v1687_v2  ;;  %s1692_s25 = smov 88   ;;  %s1693_s26 = smov 72   ;;  %v1417_v24 = vld [vmem:[%s484_s23] ss:$0 sm:$0xff]  ;;  %vm1036_vm5 = vcmask 130048   ;;  %vm1038_vm6 = vcmask 195584  }
  0x1a   : > { %1477 = vmatprep.subr.bf16.mxu0 %v1687_v2  ;;  %1485 = vmatprep.mubr.msk.bf16.mxu1 %vm1688_vm1, %v1687_v2  ;;  %s1694_s27 = smov 112   ;;  %s1695_s28 = smov 104   ;;  %vm1254_vm7 = vcmask 523264   ;;  %vm1329_vm8 = vcmask 257024  }
  0x1b   : > { %v1838_v4 = vld [vmem:[%s1821_s18] sm:$0xf]  ;;  %s1696_s30 = smov 56   ;;  %s1697_s23 = smov 64  }
  0x1c   : > { %s1698_s29 = smov 40   ;;  %s1699_s16 = smov 48  }
  0x1d   : > { %1478 = vmatpush3.bf16.msra.mxu0 %v1616_v3 }
  0x1e   : > { %1489 = vmatprep.subr.bf16.mxu0 %v1687_v2 }
  0x20   : > { %1480 = vmatmul.mubr.msk.bf16.vlgmr.msra.gmra.mrb[0].mxu0 %vm523_vm2, %v1838_v4 }
  0x21   : > { %1491 = vmatprep.mubr.msk.bf16.mxu0 %vm1688_vm1, %v1687_v2 }
  0xf3   : > { %v561_v6 = vpop.f32.mrb[0].mxu0 }
  0xf4   : > { %v562_v7 = vadd.f32 %v1412_v5, %v561_v6  ;;  %v1481_v8 = vpop.f32.mrb[1].mxu0 }
  0xf5   : > { %v564_v9 = vpop.f32.mrb[2].mxu0 }
  0xf6   : > { %v1848_v10 = vpack.c.bf16 %v562_v7, %v562_v7  ;;  %v1482_v11 = vpop.f32.mrb[3].mxu0 }
  0xf8   : > { %687 = vrot.lane.b32.xlu1 %v1848_v10, %s1689_s19  ;;  %569 = vrot.lane.b32.xlu0 %v1848_v10, %s1690_s22  ;;  %s1700_s19 = smov 8  }
  0xfc   : > { %801 = vrot.lane.b32.xlu1 %v1848_v10, %s1691_s24  ;;  %689 = vrot.lane.b32.xlu0 %v1848_v10, %s1692_s25 }
 0x100   : > { %913 = vrot.lane.b32.xlu1 %v1848_v10, %s1693_s26  ;;  %799 = vrot.lane.b32.xlu0 %v1848_v10, %s1694_s27  ;;  %s1701_s27 = smov 16  }
 0x104   : > { %911 = vrot.lane.b32.xlu0 %v1848_v10, %s1695_s28  ;;  %s1702_s28 = smov 24  }
 0x16a   : > { %v570_v12 = vpop.permute.xlu0 %569  ;;  %v688_v15 = vpop.permute.xlu1 %687 }
 0x16b   : > { %v576_v13 = vsel %vm571_vm3, %v570_v12, 0 }
 0x16c   : > { %1484 = vmatpush3.bf16.xpose.msra.mxu1 %v576_v13 }
 0x16d   : > { %1495 = vmatprep.subr.bf16.mxu1 %v1687_v2 }
 0x16e   : > { %v690_v14 = vpop.permute.xlu0 %689  ;;  %v802_v17 = vpop.permute.xlu1 %801 }
 0x16f   : > { %v695_v16 = vsel %vm571_vm3, %v690_v14, 0  ;;  %v807_v18 = vsel %vm571_vm3, %v802_v17, 0 }
 0x172   : > { %v914_v19 = vpop.permute.xlu1 %913  ;;  %v800_v20 = vpop.permute.xlu0 %799 }
 0x173   : > { %1486 = vmatmul.mubr.msk.bf16.vlgmr.msra.gmra.mrb[0].mxu1 %vm571_vm3, %v1848_v10  ;;  %v919_v21 = vsel %vm571_vm3, %v914_v19, 0 }
 0x174   : > { %1496 = vmatpush3.bf16.xpose.msra.mxu1 %v695_v16  ;;  %1497 = vmatprep.mubr.msk.bf16.mxu1 %vm1688_vm1, %v1687_v2 }
 0x175   : > { %1507 = vmatprep.subr.bf16.mxu1 %v1687_v2 }
 0x176   : > { %v912_v22 = vpop.permute.xlu0 %911 }
 0x17b   : > { %1498 = vmatmul.mubr.msk.bf16.vlgmr.msra.gmra.mrb[4].mxu1 %vm571_vm3, %v688_v15 }
 0x17c   : > { %1508 = vmatpush3.bf16.xpose.msra.mxu1 %v807_v18  ;;  %1509 = vmatprep.mubr.msk.bf16.mxu1 %vm1688_vm1, %v1687_v2 }
 0x17d   : > { %1519 = vmatprep.subr.bf16.mxu1 %v1687_v2 }
 0x183   : > { %1510 = vmatmul.mubr.msk.bf16.vlgmr.msra.gmra.mrb[8].mxu1 %vm571_vm3, %v800_v20 }
 0x184   : > { %1520 = vmatpush3.bf16.xpose.msra.mxu1 %v919_v21  ;;  %1521 = vmatprep.mubr.msk.bf16.mxu1 %vm1688_vm1, %v1687_v2 }
 0x185   : > { %1531 = vmatprep.subr.bf16.mxu1 %v1687_v2 }
 0x18b   : > { %1522 = vmatmul.mubr.msk.bf16.vlgmr.msra.gmra.mrb[12].mxu1 %vm571_vm3, %v912_v22 }
 0x18c   : > { %1535 = vmatprep.mubr.msk.bf16.mxu1 %vm1688_vm1, %v1687_v2 }
 0x246   : > { %v612_v23 = vpop.f32.mrb[0].mxu1 }
 0x247   : > { %v618_v25 = vmul.f32 0.35355338, %v612_v23  ;;  %v1487_v26 = vpop.f32.mrb[1].mxu1 }
 0x248   : > { %v615_v27 = vpop.f32.mrb[2].mxu1 }
 0x249   : > { %v1488_v28 = vpop.f32.mrb[3].mxu1  ;;  %v625_v29 = vadd.f32 %v1417_v24, %v618_v25 }
 0x24b   : > { %v626_v30 = vsel %vm571_vm3, %v625_v29, -inf }
 0x24c   : > { %627 = vmax.xlane.f32.xlu1 %v626_v30 }
 0x24e   : > { %v731_v31 = vpop.f32.mrb[4].mxu1 }
 0x24f   : > { %v737_v32 = vmul.f32 0.35355338, %v731_v31  ;;  %v1499_v33 = vpop.f32.mrb[5].mxu1 }
 0x250   : > { %v734_v34 = vpop.f32.mrb[6].mxu1 }
 0x251   : > { %v1500_v35 = vpop.f32.mrb[7].mxu1  ;;  %v738_v36 = vadd.f32 %v1417_v24, %v737_v32 }
 0x253   : > { %v739_v37 = vsel %vm571_vm3, %v738_v36, -inf }
 0x254   : > { %740 = vmax.xlane.f32.xlu0 %v739_v37 }
 0x256   : > { %v843_v38 = vpop.f32.mrb[8].mxu1 }
 0x257   : > { %v849_v39 = vmul.f32 0.35355338, %v843_v38  ;;  %v1511_v40 = vpop.f32.mrb[9].mxu1 }
 0x258   : > { %v846_v41 = vpop.f32.mrb[10].mxu1 }
 0x259   : > { %v1512_v42 = vpop.f32.mrb[11].mxu1  ;;  %v850_v43 = vadd.f32 %v1417_v24, %v849_v39 }
 0x25a   : > { %v1617_v42 = vld [vmem:[%s1996_s4] sm:$0xff]  }
 0x25b   : > { %v851_v44 = vsel %vm571_vm3, %v850_v43, -inf  ;;  %1532 = vmatpush3.bf16.msra.mxu1 %v1617_v42 }
 0x25c   : > { %852 = vmax.xlane.f32.xlu0 %v851_v44  ;;  %1533 = vmatprep.subr.bf16.mxu1 %v1687_v2 }
 0x25e   : > { %v955_v45 = vpop.f32.mrb[12].mxu1 }
 0x25f   : > { %v961_v46 = vmul.f32 0.35355338, %v955_v45  ;;  %v1523_v47 = vpop.f32.mrb[13].mxu1 }
 0x260   : > { %v958_v48 = vpop.f32.mrb[14].mxu1 }
 0x261   : > { %v1524_v49 = vpop.f32.mrb[15].mxu1  ;;  %v962_v50 = vadd.f32 %v1417_v24, %v961_v46 }
 0x263   : > { %v963_v51 = vsel %vm571_vm3, %v962_v50, -inf }
 0x264   : > { %964 = vmax.xlane.f32.xlu1 %v963_v51 }
 0x2d9   : > { %v628_v52 = vpop.xlane.xlu1 %627 }
 0x2da   : > { %v629_v53 = vsub.f32 %v625_v29, %v628_v52 }
 0x2dc   : > { %v630_v54 = vmul.f32 1.442695, %v629_v53 }
 0x2de   : > { %1625 = vpow2.f32 %v630_v54 }
 0x2e1   : > { %v741_v55 = vpop.xlane.xlu0 %740 }
 0x2e2   : > { %v742_v56 = vsub.f32 %v738_v36, %v741_v55 }
 0x2e4   : > { %v743_v57 = vmul.f32 1.442695, %v742_v56 }
 0x2e6   : > { %1627 = vpow2.f32 %v743_v57 }
 0x2e8   : > { %v1626_v58 = vpop.eup %1625 }
 0x2e9   : > { %v853_v59 = vpop.xlane.xlu0 %852  ;;  %v632_v60 = vsel %vm571_vm3, %v1626_v58, 0.0 }
 0x2ea   : > { %v854_v61 = vsub.f32 %v850_v43, %v853_v59  ;;  %633 = vadd.xlane.f32.xlu0 %v632_v60  ;;  %v1618_v43 = vld [vmem:[%s1996_s4 + $0x8] sm:$0xff]   ;;  %v1425_v59 = vld [vmem:[%s1997_s5] ss:$0 sm:$0xff]  ;;  %v498_v60 = vunpack.c.l.bf16 %v1838_v4 }
 0x2eb   : > { %1534 = vmatpush3.bf16.msra.mxu1 %v1618_v43  ;;  %v1619_v4 = vld [vmem:[%s2000_s8] sm:$0xff]  }
 0x2ec   : > { %v855_v62 = vmul.f32 1.442695, %v854_v61  ;;  %1547 = vmatprep.subr.bf16.mxu1 %v1687_v2 }
 0x2ee   : > { %1629 = vpow2.f32 %v855_v62 }
 0x2f0   : > { %v1628_v63 = vpop.eup %1627 }
 0x2f1   : > { %v745_v0 = vsel %vm571_vm3, %v1628_v63, 0.0  ;;  %v965_v5 = vpop.xlane.xlu1 %964 }
 0x2f2   : > { %746 = vadd.xlane.f32.xlu1 %v745_v0  ;;  %v966_v6 = vsub.f32 %v962_v50, %v965_v5 }
 0x2f4   : > { %v967_v7 = vmul.f32 1.442695, %v966_v6 }
 0x2f6   : > { %1631 = vpow2.f32 %v967_v7 }
 0x2f8   : > { %v1630_v1 = vpop.eup %1629 }
 0x2f9   : > { %v857_v3 = vsel %vm571_vm3, %v1630_v1, 0.0 }
 0x2fa   : > { %858 = vadd.xlane.f32.xlu0 %v857_v3 }
 0x300   : > { %v1632_v8 = vpop.eup %1631 }
 0x301   : > { %v969_v9 = vsel %vm571_vm3, %v1632_v8, 0.0 }
 0x303   : > { %751 = vrot.lane.b32.xlu1 %v1848_v10, %s1696_s30 }
 0x310   : > { %638 = vrot.lane.b32.xlu0 %v1848_v10, %s1697_s23 }
 0x314   : > { %975 = vrot.lane.b32.xlu0 %v1848_v10, %s1698_s29 }
 0x327   : > { %970 = vadd.xlane.f32.xlu1 %v969_v9 }
 0x338   : > { %863 = vrot.lane.b32.xlu1 %v1848_v10, %s1699_s16 }
 0x377   : > { %v634_v11 = vpop.xlane.xlu0 %633 }
 0x378   : > { %1633 = vrcp.f32 %v634_v11 }
 0x37f   : > { %v747_v12 = vpop.xlane.xlu1 %746 }
 0x380   : > { %1635 = vrcp.f32 %v747_v12  ;;  %v1620_v12 = vld [vmem:[%s2000_s8 + $0x8] sm:$0xff]  }
 0x382   : > { %v1634_v13 = vpop.eup %1633 }
 0x383   : > { %v636_v15 = vmul.f32 %v1634_v13, %v1626_v58  ;;  %v752_v18 = vpop.permute.xlu1 %751 }
 0x384   : > { %v757_v21 = vsel %vm643_vm4, %v752_v18, 0 }
 0x385   : > { %v637_v19 = vpack.c.bf16 %v636_v15, %v636_v15 }
 0x387   : > { %v859_v14 = vpop.xlane.xlu0 %858 }
 0x388   : > { %1637 = vrcp.f32 %v859_v14 }
 0x38a   : > { %v1636_v20 = vpop.eup %1635 }
 0x38b   : > { %v639_v16 = vpop.permute.xlu0 %638  ;;  %v749_v10 = vmul.f32 %v1636_v20, %v1628_v63 }
 0x38c   : > { %v645_v17 = vsel %vm643_vm4, %v639_v16, 0 }
 0x38d   : > { %1490 = vmatpush3.bf16.msra.mxu0 %v645_v17  ;;  %v750_v22 = vpack.c.bf16 %v749_v10, %v749_v10  ;;  %v1429_v17 = vld [vmem:[%s1998_s6] ss:$0 sm:$0xff] }
 0x38e   : > { %1501 = vmatprep.subr.bf16.mxu0 %v1687_v2 }
 0x38f   : > { %v976_v28 = vpop.permute.xlu0 %975 }
 0x390   : > { %1492 = vmatmul.mubr.msk.bf16.vlgmr.msra.gmra.mrb[4].mxu0 %vm571_vm3, %v637_v19  ;;  %v981_v30 = vsel %vm643_vm4, %v976_v28, 0  ;;  %v1430_v19 = vld [vmem:[%s1999_s7] ss:$0 sm:$0xff] }
 0x391   : > { %1502 = vmatpush3.bf16.msra.mxu0 %v757_v21  ;;  %1503 = vmatprep.mubr.msk.bf16.mxu0 %vm1688_vm1, %v1687_v2 }
 0x392   : > { %1513 = vmatprep.subr.bf16.mxu0 %v1687_v2  ;;  %v1638_v23 = vpop.eup %1637 }
 0x393   : > { %v861_v25 = vmul.f32 %v1638_v23, %v1630_v1  ;;  %v1622_v23 = vld [vmem:[%s2002_s10 + $0x8] sm:$0xff]  }
 0x395   : > { %v862_v29 = vpack.c.bf16 %v861_v25, %v861_v25  ;;  %v1624_v25 = vld [vmem:[%s2002_s10 + $0x18] sm:$0xff]  }
 0x398   : > { %1504 = vmatmul.mubr.msk.bf16.vlgmr.msra.gmra.mrb[8].mxu0 %vm571_vm3, %v750_v22  ;;  %v1621_v22 = vld [vmem:[%s2002_s10] sm:$0xff]  }
 0x399   : > { %1515 = vmatprep.mubr.msk.bf16.mxu0 %vm1688_vm1, %v1687_v2 }
 0x3b4   : > { %v971_v24 = vpop.xlane.xlu1 %970 }
 0x3b5   : > { %1639 = vrcp.f32 %v971_v24  ;;  %v1623_v24 = vld [vmem:[%s2002_s10 + $0x10] sm:$0xff]  }
 0x3b8   : > { %v864_v26 = vpop.permute.xlu1 %863 }
 0x3b9   : > { %v869_v27 = vsel %vm643_vm4, %v864_v26, 0  ;;  %v1431_v26 = vld [vmem:[%s2001_s9] ss:$0 sm:$0xff] }
 0x3ba   : > { %1514 = vmatpush3.bf16.msra.mxu0 %v869_v27 }
 0x3bb   : > { %1525 = vmatprep.subr.bf16.mxu0 %v1687_v2 }
 0x3bd   : > { %1516 = vmatmul.mubr.msk.bf16.vlgmr.msra.gmra.mrb[12].mxu0 %vm571_vm3, %v862_v29 }
 0x3be   : > { %1526 = vmatpush3.bf16.msra.mxu0 %v981_v30  ;;  %1527 = vmatprep.mubr.msk.bf16.mxu0 %vm1688_vm1, %v1687_v2 }
 0x3bf   : > { %v1640_v31 = vpop.eup %1639  ;;  %1539 = vmatprep.subr.bf16.mxu0 %v1687_v2 }
 0x3c0   : > { %v973_v32 = vmul.f32 %v1640_v31, %v1632_v8 }
 0x3c2   : > { %v974_v33 = vpack.c.bf16 %v973_v32, %v973_v32 }
 0x3c5   : > { %1528 = vmatmul.mubr.msk.bf16.vlgmr.msra.gmra.mrb[16].mxu0 %vm571_vm3, %v974_v33 }
 0x3c6   : > { %1543 = vmatprep.mubr.msk.bf16.mxu0 %vm1688_vm1, %v1687_v2  ;;  %1540 = vmatpush3.bf16.msra.mxu0 %v1619_v4 }
 0x3c7   : > { %1541 = vmatprep.subr.bf16.mxu0 %v1687_v2 }
 0x3ca   : > { %1542 = vmatpush3.bf16.msra.mxu0 %v1620_v12 }
 0x463   : > { %v681_v34 = vpop.f32.mrb[4].mxu0 }
 0x464   : > { %v1493_v35 = vpop.f32.mrb[5].mxu0 }
 0x465   : > { %v684_v36 = vpop.f32.mrb[6].mxu0 }
 0x466   : > { %v1494_v37 = vpop.f32.mrb[7].mxu0 }
 0x46b   : > { %v793_v38 = vpop.f32.mrb[8].mxu0 }
 0x46c   : > { %1024 = vrot.lane.b32.xlu1 %v793_v38, %s1700_s19  ;;  %v1505_v39 = vpop.f32.mrb[9].mxu0 }
 0x46d   : > { %v796_v40 = vpop.f32.mrb[10].mxu0 }
 0x46e   : > { %v1506_v41 = vpop.f32.mrb[11].mxu0 }
 0x46f   : > { %v1435_v41 = vld [vmem:[%s2003_s11] ss:$0 sm:$0xff] }
 0x490   : > { %v905_v44 = vpop.f32.mrb[12].mxu0 }
 0x491   : > { %1028 = vrot.lane.b32.xlu0 %v905_v44, %s1701_s27  ;;  %v1517_v45 = vpop.f32.mrb[13].mxu0 }
 0x492   : > { %v908_v46 = vpop.f32.mrb[14].mxu0 }
 0x493   : > { %v1518_v47 = vpop.f32.mrb[15].mxu0 }
 0x498   : > { %v1017_v48 = vpop.f32.mrb[16].mxu0 }
 0x499   : > { %1032 = vrot.lane.b32.xlu1 %v1017_v48, %s1702_s28  ;;  %v1529_v49 = vpop.f32.mrb[17].mxu0 }
 0x49a   : > { %v1020_v50 = vpop.f32.mrb[18].mxu0 }
 0x49b   : > { %v1530_v51 = vpop.f32.mrb[19].mxu0 }
 0x4de   : > { %v1025_v52 = vpop.permute.xlu1 %1024 }
 0x4df   : > { %v1035_v54 = vsel %vm571_vm3, %v681_v34, %v1025_v52 }
 0x503   : > { %v1029_v53 = vpop.permute.xlu0 %1028 }
 0x504   : > { %v1037_v55 = vsel %vm1036_vm5, %v1035_v54, %v1029_v53 }
 0x50b   : > { %v1033_v56 = vpop.permute.xlu1 %1032 }
 0x50c   : > { %v1039_v57 = vsel %vm1038_vm6, %v1037_v55, %v1033_v56 }
 0x50d   : > { %v1040_v58 = vpack.c.bf16 %v1039_v57, %v1039_v57 }
 0x50f   : > { %1536 = vmatmul.mubr.msk.bf16.vlgmr.msra.gmra.mrb[16].mxu1 %vm523_vm2, %v1040_v58  ;;  %v1441_v58 = vld [vmem:[%s2004_s12] ss:$0 sm:$0xff] }
 0x510   : > { %1555 = vmatprep.mubr.msk.bf16.mxu1 %vm1688_vm1, %v1687_v2  ;;  %1548 = vmatpush3.bf16.msra.mxu1 %v1621_v22 }
 0x511   : > { %1549 = vmatprep.subr.bf16.mxu1 %v1687_v2 }
 0x514   : > { %1550 = vmatpush3.bf16.msra.mxu1 %v1622_v23 }
 0x515   : > { %1551 = vmatprep.subr.bf16.mxu1 %v1687_v2 }
 0x518   : > { %1552 = vmatpush3.bf16.msra.mxu1 %v1623_v24 }
 0x519   : > { %1553 = vmatprep.subr.bf16.mxu1 %v1687_v2 }
 0x51c   : > { %1554 = vmatpush3.bf16.msra.mxu1 %v1624_v25 }
 0x5e2   : > { %v1101_v61 = vpop.f32.mrb[16].mxu1 }
 0x5e3   : > { %v1102_v62 = vadd.f32 %v1425_v59, %v1101_v61  ;;  %v1537_v63 = vpop.f32.mrb[17].mxu1 }
 0x5e4   : > { %v1104_v0 = vpop.f32.mrb[18].mxu1 }
 0x5e5   : > { %v1538_v1 = vpop.f32.mrb[19].mxu1  ;;  %v1107_v3 = vadd.f32 %v1102_v62, %v498_v60  ;;  %v1442_v60 = vld [vmem:[%s2005_s13] ss:$0 sm:$0xff] }
 0x5e7   : > { %v1108_v5 = vsel %vm523_vm2, %v1107_v3, 0.0 }
 0x5e8   : > { %1109 = vadd.xlane.f32.xlu0 %v1108_v5 }
 0x675   : > { %v1110_v6 = vpop.xlane.xlu0 %1109 }
 0x676   : > { %v1112_v7 = vmul.f32 0.03125, %v1110_v6 }
 0x678   : > { %v1113_v8 = vsub.f32 %v1107_v3, %v1112_v7 }
 0x67a   : > { %v1114_v9 = vmul.f32 %v1113_v8, %v1113_v8 }
 0x67c   : > { %v1115_v11 = vsel %vm523_vm2, %v1114_v9, 0.0 }
 0x67d   : > { %1116 = vadd.xlane.f32.xlu1 %v1115_v11 }
 0x70a   : > { %v1117_v13 = vpop.xlane.xlu1 %1116 }
 0x70b   : > { %v1118_v14 = vmul.f32 0.03125, %v1117_v13 }
 0x70d   : > { %v1119_v15 = vadd.f32 1e-12, %v1118_v14 }
 0x70f   : > { %1641 = vrsqrt.f32 %v1119_v15 }
 0x719   : > { %v1642_v16 = vpop.eup %1641 }
 0x71a   : > { %v1121_v18 = vmul.f32 %v1642_v16, %v1113_v8 }
 0x71c   : > { %v1129_v20 = vmul.f32 %v1429_v17, %v1121_v18 }
 0x71e   : > { %v1137_v21 = vadd.f32 %v1430_v19, %v1129_v20 }
 0x720   : > { %v1138_v10 = vpack.c.bf16 %v1137_v21, %v1137_v21 }
 0x722   : > { %1544 = vmatmul.mubr.msk.bf16.vlgmr.msra.gmra.mrb[20].mxu0 %vm523_vm2, %v1138_v10 }
 0x7f5   : > { %v1199_v27 = vpop.f32.mrb[20].mxu0 }
 0x7f6   : > { %v1200_v28 = vadd.f32 %v1431_v26, %v1199_v27  ;;  %v1545_v29 = vpop.f32.mrb[21].mxu0 }
 0x7f7   : > { %v1202_v30 = vpop.f32.mrb[22].mxu0 }
 0x7f8   : > { %v1206_v31 = vmul.f32 0.044715, %v1200_v28  ;;  %v1546_v32 = vpop.f32.mrb[23].mxu0  ;;  %v1205_v38 = vmul.f32 0.5, %v1200_v28 }
 0x7fa   : > { %v1207_v33 = vmul.f32 %v1206_v31, %v1200_v28 }
 0x7fc   : > { %v1208_v34 = vmul.f32 %v1207_v33, %v1200_v28 }
 0x7fe   : > { %v1209_v35 = vadd.f32 %v1208_v34, %v1200_v28 }
 0x800   : > { %v1210_v36 = vmul.f32 0.7978846, %v1209_v35 }
 0x802   : > { %1643 = vtanh.f32 %v1210_v36 }
 0x80c   : > { %v1644_v37 = vpop.eup %1643 }
 0x80d   : > { %v1212_v39 = vadd.f32 1.0, %v1644_v37 }
 0x80f   : > { %v1213_v2 = vmul.f32 %v1212_v39, %v1205_v38 }
 0x811   : > { %v1214_v40 = vpack.c.bf16 %v1213_v2, %v1213_v2 }
 0x813   : > { %1556 = vmatmul.mubr.msk.bf16.vlgmr.msra.gmra.mrb[20].mxu1 %vm1254_vm7, %v1214_v40 }
 0x8e6   : > { %v1292_v42 = vpop.f32.mrb[20].mxu1 }
 0x8e7   : > { %v1293_v43 = vadd.f32 %v1435_v41, %v1292_v42  ;;  %v1557_v44 = vpop.f32.mrb[21].mxu1 }
 0x8e8   : > { %v1295_v45 = vpop.f32.mrb[22].mxu1 }
 0x8e9   : > { %v1558_v46 = vpop.f32.mrb[23].mxu1  ;;  %v1298_v47 = vadd.f32 %v1293_v43, %v1137_v21 }
 0x8eb   : > { %v1299_v48 = vsel %vm523_vm2, %v1298_v47, 0.0 }
 0x8ec   : > { %1300 = vadd.xlane.f32.xlu0 %v1299_v48 }
 0x979   : > { %v1301_v49 = vpop.xlane.xlu0 %1300 }
 0x97a   : > { %v1302_v50 = vmul.f32 0.03125, %v1301_v49 }
 0x97c   : > { %v1303_v51 = vsub.f32 %v1298_v47, %v1302_v50 }
 0x97e   : > { %v1304_v52 = vmul.f32 %v1303_v51, %v1303_v51 }
 0x980   : > { %v1305_v53 = vsel %vm523_vm2, %v1304_v52, 0.0 }
 0x981   : > { %1306 = vadd.xlane.f32.xlu0 %v1305_v53 }
 0xa0e   : > { %v1307_v54 = vpop.xlane.xlu0 %1306 }
 0xa0f   : > { %v1308_v55 = vmul.f32 0.03125, %v1307_v54 }
 0xa11   : > { %v1309_v56 = vadd.f32 1e-12, %v1308_v55 }
 0xa13   : > { %1645 = vrsqrt.f32 %v1309_v56 }
 0xa1d   : > { %v1646_v57 = vpop.eup %1645 }
 0xa1e   : > { %v1311_v59 = vmul.f32 %v1646_v57, %v1303_v51 }
 0xa20   : > { %v1319_v61 = vmul.f32 %v1441_v58, %v1311_v59 }
 0xa22   : > { %v1327_v62 = vadd.f32 %v1442_v60, %v1319_v61 }
 0xa24   : > { %v1328_v63 = vpack.c.bf16 %v1327_v62, %v1327_v62 }
 0xa26   : > { %1330 = vst.msk [vmem:[%s1821_s18] sm:$0xf] %vm1329_vm8, %v1328_v63 }
 0xa27 PF: > { %s24_s17 = sadd.s32 1, %s1685_s17   ;;  %s2011_s30 = sld [smem:[#allocation2_spill]] }
 0xa28   : > { %p21_p7 = scmp.ge.s32.totalorder %s24_s17, 6   ;;  %s2012_s20 = sld [smem:[#allocation3_spill]] }
 0xa29   : > { %s2013_s16 = sld [smem:[#allocation4_spill]]  ;;  %s2014_s29 = smov %s1677_s15 }
 0xa2a   :  { %23 = sbr.rel (!%p21_p7) target bundleno = 3 (0x3), region = 113 }
 0xa2e   : > { %s2015_s15 = smov %s2012_s20 }

</bundles_post_ra>
